<compile_context>
chip_gen: v6e
topology: v6e:2x2x1
jax: 0.10.0
libtpu: 0.0.40
codegen_flags: <defaults>
</compile_context>

<pallas_src>
import jax
import jax.numpy as jnp
from jax import lax
from jax.experimental import pallas as pl
from jax.experimental.pallas import tpu as pltpu

_LANES = 128


def _round_up(x, m):
    return (x + m - 1) // m * m


def _lstm_maxpool_kernel(len_ref, floor_ref, xp_ref, whh_ref, out_ref):
    """Serial LSTM recurrence + masked max-pool, single invocation.

    len_ref:   (B, 1)        int32   sequence lengths
    floor_ref: (B, 1)        float32 0.0 if the row is shorter than the batch
                                     max (pad_packed zeros join the max),
                                     -inf otherwise
    xp_ref:    (T, B, 4*Hp)  float32 precomputed x @ W_ih^T + bias
                                     (gate order i,f,g,o; each gate padded to Hp)
    whh_ref:   (Hp, 4*Hp)    float32 recurrent weights (per-gate lane padded)
    out_ref:   (B, Hp)       float32 max-pooled hidden states
    """
    T, B, _ = xp_ref.shape
    Hp = whh_ref.shape[0]

    len_vec = len_ref[...]                      # (B, 1) loop invariant
    whh = whh_ref[...]                          # (Hp, 4Hp) resident

    h0 = jnp.zeros((B, Hp), jnp.float32)
    c0 = jnp.zeros((B, Hp), jnp.float32)
    m0 = jnp.zeros((B, Hp), jnp.float32) + floor_ref[...]   # broadcast (B,1)->(B,Hp)

    def step(t, carry):
        h, c, m = carry
        # Only the recurrent matmul remains on the serial critical path.
        gates = xp_ref[t] + jnp.dot(h, whh, preferred_element_type=jnp.float32)
        i_g = jax.nn.sigmoid(gates[:, 0 * Hp:1 * Hp])
        f_g = jax.nn.sigmoid(gates[:, 1 * Hp:2 * Hp])
        g_g = jnp.tanh(gates[:, 2 * Hp:3 * Hp])
        o_g = jax.nn.sigmoid(gates[:, 3 * Hp:4 * Hp])
        c_new = f_g * c + i_g * g_g
        h_new = o_g * jnp.tanh(c_new)

        # packed-sequence semantics: state frozen once t >= length[b].
        valid = t < len_vec                     # (B, 1) bool
        h = jnp.where(valid, h_new, h)
        c = jnp.where(valid, c_new, c)
        m = jnp.where(valid, jnp.maximum(m, h_new), m)
        return h, c, m

    # Short, static trip count -> fully unroll so the LLO scheduler can overlap
    # gate math of step t with the recurrent matmul of step t+1.
    _, _, m = lax.fori_loop(0, T, step, (h0, c0, m0), unroll=True)
    out_ref[...] = m


def _lstm_maxpool_call(lens, floor, x_proj, w_hh_p):
    T, B, G = x_proj.shape
    Hp = w_hh_p.shape[0]
    vmem = lambda: pl.BlockSpec(memory_space=pltpu.MemorySpace.VMEM)
    return pl.pallas_call(
        _lstm_maxpool_kernel,
        out_shape=jax.ShapeDtypeStruct((B, Hp), jnp.float32),
        in_specs=[vmem(), vmem(), vmem(), vmem()],
        out_specs=vmem(),
    )(lens, floor, x_proj, w_hh_p)


def _prepare_gate_params(w_ih, w_hh, b_ih, b_hh, Hp):
    """Transpose + per-gate zero pad so each gate occupies full 128-lane blocks."""
    H4, _ = w_ih.shape
    H = H4 // 4

    def pad_gate_cols(w_t):                     # (K, 4H) -> (K, 4Hp)
        parts = [jnp.pad(w_t[:, g * H:(g + 1) * H], ((0, 0), (0, Hp - H)))
                 for g in range(4)]
        return jnp.concatenate(parts, axis=1)

    w_ih_p = pad_gate_cols(w_ih.T.astype(jnp.float32))                        # (E, 4Hp)
    w_hh_p = jnp.pad(pad_gate_cols(w_hh.T.astype(jnp.float32)),
                     ((0, Hp - H), (0, 0)))                                   # (Hp, 4Hp)
    bias_p = pad_gate_cols((b_ih + b_hh).astype(jnp.float32).reshape(1, H4))  # (1, 4Hp)
    return w_ih_p, w_hh_p, bias_p


def encoder_forward(token_ids, lengths, emb_table, w_ih, w_hh, b_ih, b_hh):
    """Equivalent of Encoder.forward(inputs, input_length, pooling='max')."""
    B, T = token_ids.shape
    H = w_hh.shape[1]
    Hp = _round_up(H, _LANES)

    w_ih_p, w_hh_p, bias_p = _prepare_gate_params(w_ih, w_hh, b_ih, b_hh, Hp)

    # Embedding lookup (GloVe table; row 0 is the padding vector).
    embedded = jnp.take(emb_table, token_ids, axis=0).astype(jnp.float32)     # (B,T,E)

    # Non-recurrent input projection: ONE large MXU matmul over all T*B tokens,
    # emitted time-major so the kernel reads contiguous (B, 4Hp) slabs per step.
    x_proj = jnp.einsum(
        "bte,eg->tbg", embedded, w_ih_p,
        precision=lax.Precision.HIGHEST,
        preferred_element_type=jnp.float32) + bias_p                          # (T,B,4Hp)

    lens = lengths.astype(jnp.int32).reshape(B, 1)
    max_len = jnp.max(lens)
    # pad_packed_sequence zero-pads rows shorter than the batch max; those
    # zeros participate in the max pool.  (No host sync: all traced.)
    floor = jnp.where(lens < max_len, 0.0, -jnp.inf).astype(jnp.float32)      # (B,1)

    out_p = _lstm_maxpool_call(lens, floor, x_proj, w_hh_p)                   # (B,Hp)
    return out_p[:, :H]


def _reference_forward(token_ids, lengths, emb_table, w_ih, w_hh, b_ih, b_hh):
    """Pure-JAX reference mirroring PyTorch packed-LSTM + max-pool semantics."""
    embedded = jnp.take(emb_table, token_ids, axis=0).astype(jnp.float32)
    T_eff = int(jnp.max(lengths))            # pad_packed truncates to batch max
    x = jnp.transpose(embedded[:, :T_eff, :], (1, 0, 2))
    B = x.shape[1]
    H = w_hh.shape[1]
    hi = lax.Precision.HIGHEST
    h = jnp.zeros((B, H), jnp.float32)
    c = jnp.zeros((B, H), jnp.float32)
    pooled = jnp.full((B, H), -jnp.inf, jnp.float32)
    for t in range(T_eff):
        gates = (jnp.dot(x[t], w_ih.T, precision=hi)
                 + jnp.dot(h, w_hh.T, precision=hi) + b_ih + b_hh)
        i_g = jax.nn.sigmoid(gates[:, 0 * H:1 * H])
        f_g = jax.nn.sigmoid(gates[:, 1 * H:2 * H])
        g_g = jnp.tanh(gates[:, 2 * H:3 * H])
        o_g = jax.nn.sigmoid(gates[:, 3 * H:4 * H])
        c_new = f_g * c + i_g * g_g
        h_new = o_g * jnp.tanh(c_new)
        valid = (t < lengths)[:, None]
        h = jnp.where(valid, h_new, h)
        c = jnp.where(valid, c_new, c)
        pooled = jnp.maximum(pooled, jnp.where(valid, h_new, 0.0))
    return pooled


if __name__ == "__main__":
    vocab_size = 50
    embed_size = 32    # GloVe dim
    hidden_size = 32
    B, T = 4, 8

    key = jax.random.PRNGKey(0)
    k_emb, k_wih, k_whh, k_bih, k_bhh, k_tok = jax.random.split(key, 6)

    # Deterministic "GloVe" embedding table; padding_idx=0 row is zeros.
    emb_table = jax.random.normal(k_emb, (vocab_size, embed_size), jnp.float32) * 0.25
    emb_table = emb_table.at[0].set(0.0)

    # LSTM parameters, PyTorch-style uniform(-1/sqrt(H), 1/sqrt(H)), gate order i,f,g,o.
    bound = 1.0 / (hidden_size ** 0.5)
    w_ih = jax.random.uniform(k_wih, (4 * hidden_size, embed_size), jnp.float32, -bound, bound)
    w_hh = jax.random.uniform(k_whh, (4 * hidden_size, hidden_size), jnp.float32, -bound, bound)
    b_ih = jax.random.uniform(k_bih, (4 * hidden_size,), jnp.float32, -bound, bound)
    b_hh = jax.random.uniform(k_bhh, (4 * hidden_size,), jnp.float32, -bound, bound)

    token_ids = jax.random.randint(k_tok, (B, T), 1, vocab_size, jnp.int32)

    fwd = jax.jit(encoder_forward)

    # Case 1: longest row fills the whole buffer (max(lengths) == T).
    # Case 2: max(lengths) < T, exercising the static-T masking + padded-zero pooling.
    for lengths in (jnp.array([T, T - 2, 5, 3], dtype=jnp.int32),
                    jnp.array([T - 3, T - 3, 4, 1], dtype=jnp.int32)):
        pos = jnp.arange(T)[None, :]
        toks = jnp.where(pos < lengths[:, None], token_ids, 0)  # padding_idx = 0

        out = jax.block_until_ready(fwd(toks, lengths, emb_table, w_ih, w_hh, b_ih, b_hh))
        ref = _reference_forward(toks, lengths, emb_table, w_ih, w_hh, b_ih, b_hh)

        assert out.shape == (B, hidden_size)
        err = float(jnp.max(jnp.abs(out - ref)))
        assert jnp.allclose(out, ref, atol=1e-4, rtol=1e-4), f"mismatch vs reference (max abs err {err})"

    print("KERNEL_OK")
</pallas_src>

<mosaic_0001>
module attributes {stable_mosaic.version = 11 : i64} {
  func.func @_lstm_maxpool_kernel(%arg0: memref<4x1xi32, #tpu.memory_space<vmem>>, %arg1: memref<4x1xf32, #tpu.memory_space<vmem>>, %arg2: memref<8x4x512xf32, #tpu.memory_space<vmem>>, %arg3: memref<128x512xf32, #tpu.memory_space<vmem>>, %arg4: memref<4x128xf32, #tpu.memory_space<vmem>>) attributes {dimension_semantics = [], scalar_prefetch = 0 : i64, scratch_operands = 0 : i64, tpu.core_type = #tpu.core_type<tc>} {
    %c0 = arith.constant 0 : index
    %c0_0 = arith.constant 0 : index
    %0 = vector.load %arg0[%c0, %c0_0] : memref<4x1xi32, #tpu.memory_space<vmem>>, vector<4x1xi32>
    %c0_1 = arith.constant 0 : index
    %c0_2 = arith.constant 0 : index
    %1 = vector.load %arg3[%c0_1, %c0_2] : memref<128x512xf32, #tpu.memory_space<vmem>>, vector<128x512xf32>
    %cst = arith.constant 0.000000e+00 : f32
    %2 = vector.broadcast %cst : f32 to vector<4x128xf32>
    %cst_3 = arith.constant 0.000000e+00 : f32
    %3 = vector.broadcast %cst_3 : f32 to vector<4x128xf32>
    %cst_4 = arith.constant 0.000000e+00 : f32
    %4 = vector.broadcast %cst_4 : f32 to vector<4x128xf32>
    %c0_5 = arith.constant 0 : index
    %c0_6 = arith.constant 0 : index
    %5 = vector.load %arg1[%c0_5, %c0_6] : memref<4x1xf32, #tpu.memory_space<vmem>>, vector<4x1xf32>
    %6 = vector.broadcast %5 : vector<4x1xf32> to vector<4x128xf32>
    %7 = arith.addf %4, %6 : vector<4x128xf32>
    %c0_i32 = arith.constant 0 : i32
    %8 = arith.index_cast %c0_i32 : i32 to index
    %c0_7 = arith.constant 0 : index
    %c0_8 = arith.constant 0 : index
    %9 = vector.load %arg2[%8, %c0_7, %c0_8] : memref<8x4x512xf32, #tpu.memory_space<vmem>>, vector<1x4x512xf32>
    %10 = vector.shape_cast %9 : vector<1x4x512xf32> to vector<4x512xf32>
    %cst_9 = arith.constant dense<0.000000e+00> : vector<4x512xf32>
    %11 = tpu.matmul %2, %1, %cst_9 {dimension_numbers = #tpu.dot_dimension_numbers<[1], [0], [0], [1], [0, 0, 1, 1], [], []>} : vector<4x128xf32>, vector<128x512xf32>, vector<4x512xf32> -> vector<4x512xf32>
    %12 = arith.addf %10, %11 : vector<4x512xf32>
    %13 = vector.extract_strided_slice %12 {offsets = [0, 0], sizes = [4, 128], strides = [1, 1]} : vector<4x512xf32> to vector<4x128xf32>
    %14 = arith.negf %13 : vector<4x128xf32>
    %15 = math.exp %14 : vector<4x128xf32>
    %cst_10 = arith.constant 1.000000e+00 : f32
    %16 = vector.broadcast %cst_10 : f32 to vector<4x128xf32>
    %17 = arith.addf %16, %15 : vector<4x128xf32>
    %18 = arith.divf %16, %17 : vector<4x128xf32>
    %19 = vector.extract_strided_slice %12 {offsets = [0, 128], sizes = [4, 128], strides = [1, 1]} : vector<4x512xf32> to vector<4x128xf32>
    %20 = arith.negf %19 : vector<4x128xf32>
    %21 = math.exp %20 : vector<4x128xf32>
    %cst_11 = arith.constant 1.000000e+00 : f32
    %22 = vector.broadcast %cst_11 : f32 to vector<4x128xf32>
    %23 = arith.addf %22, %21 : vector<4x128xf32>
    %24 = arith.divf %22, %23 : vector<4x128xf32>
    %25 = vector.extract_strided_slice %12 {offsets = [0, 256], sizes = [4, 128], strides = [1, 1]} : vector<4x512xf32> to vector<4x128xf32>
    %26 = math.tanh %25 : vector<4x128xf32>
    %27 = vector.extract_strided_slice %12 {offsets = [0, 384], sizes = [4, 128], strides = [1, 1]} : vector<4x512xf32> to vector<4x128xf32>
    %28 = arith.negf %27 : vector<4x128xf32>
    %29 = math.exp %28 : vector<4x128xf32>
    %cst_12 = arith.constant 1.000000e+00 : f32
    %30 = vector.broadcast %cst_12 : f32 to vector<4x128xf32>
    %31 = arith.addf %30, %29 : vector<4x128xf32>
    %32 = arith.divf %30, %31 : vector<4x128xf32>
    %33 = arith.mulf %24, %3 : vector<4x128xf32>
    %34 = arith.mulf %18, %26 : vector<4x128xf32>
    %35 = arith.addf %33, %34 : vector<4x128xf32>
    %36 = math.tanh %35 : vector<4x128xf32>
    %37 = arith.mulf %32, %36 : vector<4x128xf32>
    %38 = vector.broadcast %c0_i32 : i32 to vector<4x1xi32>
    %39 = arith.cmpi slt, %38, %0 : vector<4x1xi32>
    %40 = vector.shape_cast %39 : vector<4x1xi1> to vector<4x1xi1>
    %41 = vector.broadcast %40 : vector<4x1xi1> to vector<4x128xi1>
    %42 = arith.select %41, %37, %2 : vector<4x128xi1>, vector<4x128xf32>
    %43 = vector.shape_cast %39 : vector<4x1xi1> to vector<4x1xi1>
    %44 = vector.broadcast %43 : vector<4x1xi1> to vector<4x128xi1>
    %45 = arith.select %44, %35, %3 : vector<4x128xi1>, vector<4x128xf32>
    %46 = arith.maximumf %7, %37 : vector<4x128xf32>
    %47 = vector.shape_cast %39 : vector<4x1xi1> to vector<4x1xi1>
    %48 = vector.broadcast %47 : vector<4x1xi1> to vector<4x128xi1>
    %49 = arith.select %48, %46, %7 : vector<4x128xi1>, vector<4x128xf32>
    %c1_i32 = arith.constant 1 : i32
    %50 = arith.index_cast %c1_i32 : i32 to index
    %c0_13 = arith.constant 0 : index
    %c0_14 = arith.constant 0 : index
    %51 = vector.load %arg2[%50, %c0_13, %c0_14] : memref<8x4x512xf32, #tpu.memory_space<vmem>>, vector<1x4x512xf32>
    %52 = vector.shape_cast %51 : vector<1x4x512xf32> to vector<4x512xf32>
    %cst_15 = arith.constant dense<0.000000e+00> : vector<4x512xf32>
    %53 = tpu.matmul %42, %1, %cst_15 {dimension_numbers = #tpu.dot_dimension_numbers<[1], [0], [0], [1], [0, 0, 1, 1], [], []>} : vector<4x128xf32>, vector<128x512xf32>, vector<4x512xf32> -> vector<4x512xf32>
    %54 = arith.addf %52, %53 : vector<4x512xf32>
    %55 = vector.extract_strided_slice %54 {offsets = [0, 0], sizes = [4, 128], strides = [1, 1]} : vector<4x512xf32> to vector<4x128xf32>
    %56 = arith.negf %55 : vector<4x128xf32>
    %57 = math.exp %56 : vector<4x128xf32>
    %cst_16 = arith.constant 1.000000e+00 : f32
    %58 = vector.broadcast %cst_16 : f32 to vector<4x128xf32>
    %59 = arith.addf %58, %57 : vector<4x128xf32>
    %60 = arith.divf %58, %59 : vector<4x128xf32>
    %61 = vector.extract_strided_slice %54 {offsets = [0, 128], sizes = [4, 128], strides = [1, 1]} : vector<4x512xf32> to vector<4x128xf32>
    %62 = arith.negf %61 : vector<4x128xf32>
    %63 = math.exp %62 : vector<4x128xf32>
    %cst_17 = arith.constant 1.000000e+00 : f32
    %64 = vector.broadcast %cst_17 : f32 to vector<4x128xf32>
    %65 = arith.addf %64, %63 : vector<4x128xf32>
    %66 = arith.divf %64, %65 : vector<4x128xf32>
    %67 = vector.extract_strided_slice %54 {offsets = [0, 256], sizes = [4, 128], strides = [1, 1]} : vector<4x512xf32> to vector<4x128xf32>
    %68 = math.tanh %67 : vector<4x128xf32>
    %69 = vector.extract_strided_slice %54 {offsets = [0, 384], sizes = [4, 128], strides = [1, 1]} : vector<4x512xf32> to vector<4x128xf32>
    %70 = arith.negf %69 : vector<4x128xf32>
    %71 = math.exp %70 : vector<4x128xf32>
    %cst_18 = arith.constant 1.000000e+00 : f32
    %72 = vector.broadcast %cst_18 : f32 to vector<4x128xf32>
    %73 = arith.addf %72, %71 : vector<4x128xf32>
    %74 = arith.divf %72, %73 : vector<4x128xf32>
    %75 = arith.mulf %66, %45 : vector<4x128xf32>
    %76 = arith.mulf %60, %68 : vector<4x128xf32>
    %77 = arith.addf %75, %76 : vector<4x128xf32>
    %78 = math.tanh %77 : vector<4x128xf32>
    %79 = arith.mulf %74, %78 : vector<4x128xf32>
    %80 = vector.broadcast %c1_i32 : i32 to vector<4x1xi32>
    %81 = arith.cmpi slt, %80, %0 : vector<4x1xi32>
    %82 = vector.shape_cast %81 : vector<4x1xi1> to vector<4x1xi1>
    %83 = vector.broadcast %82 : vector<4x1xi1> to vector<4x128xi1>
    %84 = arith.select %83, %79, %42 : vector<4x128xi1>, vector<4x128xf32>
    %85 = vector.shape_cast %81 : vector<4x1xi1> to vector<4x1xi1>
    %86 = vector.broadcast %85 : vector<4x1xi1> to vector<4x128xi1>
    %87 = arith.select %86, %77, %45 : vector<4x128xi1>, vector<4x128xf32>
    %88 = arith.maximumf %49, %79 : vector<4x128xf32>
    %89 = vector.shape_cast %81 : vector<4x1xi1> to vector<4x1xi1>
    %90 = vector.broadcast %89 : vector<4x1xi1> to vector<4x128xi1>
    %91 = arith.select %90, %88, %49 : vector<4x128xi1>, vector<4x128xf32>
    %c2_i32 = arith.constant 2 : i32
    %92 = arith.index_cast %c2_i32 : i32 to index
    %c0_19 = arith.constant 0 : index
    %c0_20 = arith.constant 0 : index
    %93 = vector.load %arg2[%92, %c0_19, %c0_20] : memref<8x4x512xf32, #tpu.memory_space<vmem>>, vector<1x4x512xf32>
    %94 = vector.shape_cast %93 : vector<1x4x512xf32> to vector<4x512xf32>
    %cst_21 = arith.constant dense<0.000000e+00> : vector<4x512xf32>
    %95 = tpu.matmul %84, %1, %cst_21 {dimension_numbers = #tpu.dot_dimension_numbers<[1], [0], [0], [1], [0, 0, 1, 1], [], []>} : vector<4x128xf32>, vector<128x512xf32>, vector<4x512xf32> -> vector<4x512xf32>
    %96 = arith.addf %94, %95 : vector<4x512xf32>
    %97 = vector.extract_strided_slice %96 {offsets = [0, 0], sizes = [4, 128], strides = [1, 1]} : vector<4x512xf32> to vector<4x128xf32>
    %98 = arith.negf %97 : vector<4x128xf32>
    %99 = math.exp %98 : vector<4x128xf32>
    %cst_22 = arith.constant 1.000000e+00 : f32
    %100 = vector.broadcast %cst_22 : f32 to vector<4x128xf32>
    %101 = arith.addf %100, %99 : vector<4x128xf32>
    %102 = arith.divf %100, %101 : vector<4x128xf32>
    %103 = vector.extract_strided_slice %96 {offsets = [0, 128], sizes = [4, 128], strides = [1, 1]} : vector<4x512xf32> to vector<4x128xf32>
    %104 = arith.negf %103 : vector<4x128xf32>
    %105 = math.exp %104 : vector<4x128xf32>
    %cst_23 = arith.constant 1.000000e+00 : f32
    %106 = vector.broadcast %cst_23 : f32 to vector<4x128xf32>
    %107 = arith.addf %106, %105 : vector<4x128xf32>
    %108 = arith.divf %106, %107 : vector<4x128xf32>
    %109 = vector.extract_strided_slice %96 {offsets = [0, 256], sizes = [4, 128], strides = [1, 1]} : vector<4x512xf32> to vector<4x128xf32>
    %110 = math.tanh %109 : vector<4x128xf32>
    %111 = vector.extract_strided_slice %96 {offsets = [0, 384], sizes = [4, 128], strides = [1, 1]} : vector<4x512xf32> to vector<4x128xf32>
    %112 = arith.negf %111 : vector<4x128xf32>
    %113 = math.exp %112 : vector<4x128xf32>
    %cst_24 = arith.constant 1.000000e+00 : f32
    %114 = vector.broadcast %cst_24 : f32 to vector<4x128xf32>
    %115 = arith.addf %114, %113 : vector<4x128xf32>
    %116 = arith.divf %114, %115 : vector<4x128xf32>
    %117 = arith.mulf %108, %87 : vector<4x128xf32>
    %118 = arith.mulf %102, %110 : vector<4x128xf32>
    %119 = arith.addf %117, %118 : vector<4x128xf32>
    %120 = math.tanh %119 : vector<4x128xf32>
    %121 = arith.mulf %116, %120 : vector<4x128xf32>
    %122 = vector.broadcast %c2_i32 : i32 to vector<4x1xi32>
    %123 = arith.cmpi slt, %122, %0 : vector<4x1xi32>
    %124 = vector.shape_cast %123 : vector<4x1xi1> to vector<4x1xi1>
    %125 = vector.broadcast %124 : vector<4x1xi1> to vector<4x128xi1>
    %126 = arith.select %125, %121, %84 : vector<4x128xi1>, vector<4x128xf32>
    %127 = vector.shape_cast %123 : vector<4x1xi1> to vector<4x1xi1>
    %128 = vector.broadcast %127 : vector<4x1xi1> to vector<4x128xi1>
    %129 = arith.select %128, %119, %87 : vector<4x128xi1>, vector<4x128xf32>
    %130 = arith.maximumf %91, %121 : vector<4x128xf32>
    %131 = vector.shape_cast %123 : vector<4x1xi1> to vector<4x1xi1>
    %132 = vector.broadcast %131 : vector<4x1xi1> to vector<4x128xi1>
    %133 = arith.select %132, %130, %91 : vector<4x128xi1>, vector<4x128xf32>
    %c3_i32 = arith.constant 3 : i32
    %134 = arith.index_cast %c3_i32 : i32 to index
    %c0_25 = arith.constant 0 : index
    %c0_26 = arith.constant 0 : index
    %135 = vector.load %arg2[%134, %c0_25, %c0_26] : memref<8x4x512xf32, #tpu.memory_space<vmem>>, vector<1x4x512xf32>
    %136 = vector.shape_cast %135 : vector<1x4x512xf32> to vector<4x512xf32>
    %cst_27 = arith.constant dense<0.000000e+00> : vector<4x512xf32>
    %137 = tpu.matmul %126, %1, %cst_27 {dimension_numbers = #tpu.dot_dimension_numbers<[1], [0], [0], [1], [0, 0, 1, 1], [], []>} : vector<4x128xf32>, vector<128x512xf32>, vector<4x512xf32> -> vector<4x512xf32>
    %138 = arith.addf %136, %137 : vector<4x512xf32>
    %139 = vector.extract_strided_slice %138 {offsets = [0, 0], sizes = [4, 128], strides = [1, 1]} : vector<4x512xf32> to vector<4x128xf32>
    %140 = arith.negf %139 : vector<4x128xf32>
    %141 = math.exp %140 : vector<4x128xf32>
    %cst_28 = arith.constant 1.000000e+00 : f32
    %142 = vector.broadcast %cst_28 : f32 to vector<4x128xf32>
    %143 = arith.addf %142, %141 : vector<4x128xf32>
    %144 = arith.divf %142, %143 : vector<4x128xf32>
    %145 = vector.extract_strided_slice %138 {offsets = [0, 128], sizes = [4, 128], strides = [1, 1]} : vector<4x512xf32> to vector<4x128xf32>
    %146 = arith.negf %145 : vector<4x128xf32>
    %147 = math.exp %146 : vector<4x128xf32>
    %cst_29 = arith.constant 1.000000e+00 : f32
    %148 = vector.broadcast %cst_29 : f32 to vector<4x128xf32>
    %149 = arith.addf %148, %147 : vector<4x128xf32>
    %150 = arith.divf %148, %149 : vector<4x128xf32>
    %151 = vector.extract_strided_slice %138 {offsets = [0, 256], sizes = [4, 128], strides = [1, 1]} : vector<4x512xf32> to vector<4x128xf32>
    %152 = math.tanh %151 : vector<4x128xf32>
    %153 = vector.extract_strided_slice %138 {offsets = [0, 384], sizes = [4, 128], strides = [1, 1]} : vector<4x512xf32> to vector<4x128xf32>
    %154 = arith.negf %153 : vector<4x128xf32>
    %155 = math.exp %154 : vector<4x128xf32>
    %cst_30 = arith.constant 1.000000e+00 : f32
    %156 = vector.broadcast %cst_30 : f32 to vector<4x128xf32>
    %157 = arith.addf %156, %155 : vector<4x128xf32>
    %158 = arith.divf %156, %157 : vector<4x128xf32>
    %159 = arith.mulf %150, %129 : vector<4x128xf32>
    %160 = arith.mulf %144, %152 : vector<4x128xf32>
    %161 = arith.addf %159, %160 : vector<4x128xf32>
    %162 = math.tanh %161 : vector<4x128xf32>
    %163 = arith.mulf %158, %162 : vector<4x128xf32>
    %164 = vector.broadcast %c3_i32 : i32 to vector<4x1xi32>
    %165 = arith.cmpi slt, %164, %0 : vector<4x1xi32>
    %166 = vector.shape_cast %165 : vector<4x1xi1> to vector<4x1xi1>
    %167 = vector.broadcast %166 : vector<4x1xi1> to vector<4x128xi1>
    %168 = arith.select %167, %163, %126 : vector<4x128xi1>, vector<4x128xf32>
    %169 = vector.shape_cast %165 : vector<4x1xi1> to vector<4x1xi1>
    %170 = vector.broadcast %169 : vector<4x1xi1> to vector<4x128xi1>
    %171 = arith.select %170, %161, %129 : vector<4x128xi1>, vector<4x128xf32>
    %172 = arith.maximumf %133, %163 : vector<4x128xf32>
    %173 = vector.shape_cast %165 : vector<4x1xi1> to vector<4x1xi1>
    %174 = vector.broadcast %173 : vector<4x1xi1> to vector<4x128xi1>
    %175 = arith.select %174, %172, %133 : vector<4x128xi1>, vector<4x128xf32>
    %c4_i32 = arith.constant 4 : i32
    %176 = arith.index_cast %c4_i32 : i32 to index
    %c0_31 = arith.constant 0 : index
    %c0_32 = arith.constant 0 : index
    %177 = vector.load %arg2[%176, %c0_31, %c0_32] : memref<8x4x512xf32, #tpu.memory_space<vmem>>, vector<1x4x512xf32>
    %178 = vector.shape_cast %177 : vector<1x4x512xf32> to vector<4x512xf32>
    %cst_33 = arith.constant dense<0.000000e+00> : vector<4x512xf32>
    %179 = tpu.matmul %168, %1, %cst_33 {dimension_numbers = #tpu.dot_dimension_numbers<[1], [0], [0], [1], [0, 0, 1, 1], [], []>} : vector<4x128xf32>, vector<128x512xf32>, vector<4x512xf32> -> vector<4x512xf32>
    %180 = arith.addf %178, %179 : vector<4x512xf32>
    %181 = vector.extract_strided_slice %180 {offsets = [0, 0], sizes = [4, 128], strides = [1, 1]} : vector<4x512xf32> to vector<4x128xf32>
    %182 = arith.negf %181 : vector<4x128xf32>
    %183 = math.exp %182 : vector<4x128xf32>
    %cst_34 = arith.constant 1.000000e+00 : f32
    %184 = vector.broadcast %cst_34 : f32 to vector<4x128xf32>
    %185 = arith.addf %184, %183 : vector<4x128xf32>
    %186 = arith.divf %184, %185 : vector<4x128xf32>
    %187 = vector.extract_strided_slice %180 {offsets = [0, 128], sizes = [4, 128], strides = [1, 1]} : vector<4x512xf32> to vector<4x128xf32>
    %188 = arith.negf %187 : vector<4x128xf32>
    %189 = math.exp %188 : vector<4x128xf32>
    %cst_35 = arith.constant 1.000000e+00 : f32
    %190 = vector.broadcast %cst_35 : f32 to vector<4x128xf32>
    %191 = arith.addf %190, %189 : vector<4x128xf32>
    %192 = arith.divf %190, %191 : vector<4x128xf32>
    %193 = vector.extract_strided_slice %180 {offsets = [0, 256], sizes = [4, 128], strides = [1, 1]} : vector<4x512xf32> to vector<4x128xf32>
    %194 = math.tanh %193 : vector<4x128xf32>
    %195 = vector.extract_strided_slice %180 {offsets = [0, 384], sizes = [4, 128], strides = [1, 1]} : vector<4x512xf32> to vector<4x128xf32>
    %196 = arith.negf %195 : vector<4x128xf32>
    %197 = math.exp %196 : vector<4x128xf32>
    %cst_36 = arith.constant 1.000000e+00 : f32
    %198 = vector.broadcast %cst_36 : f32 to vector<4x128xf32>
    %199 = arith.addf %198, %197 : vector<4x128xf32>
    %200 = arith.divf %198, %199 : vector<4x128xf32>
    %201 = arith.mulf %192, %171 : vector<4x128xf32>
    %202 = arith.mulf %186, %194 : vector<4x128xf32>
    %203 = arith.addf %201, %202 : vector<4x128xf32>
    %204 = math.tanh %203 : vector<4x128xf32>
    %205 = arith.mulf %200, %204 : vector<4x128xf32>
    %206 = vector.broadcast %c4_i32 : i32 to vector<4x1xi32>
    %207 = arith.cmpi slt, %206, %0 : vector<4x1xi32>
    %208 = vector.shape_cast %207 : vector<4x1xi1> to vector<4x1xi1>
    %209 = vector.broadcast %208 : vector<4x1xi1> to vector<4x128xi1>
    %210 = arith.select %209, %205, %168 : vector<4x128xi1>, vector<4x128xf32>
    %211 = vector.shape_cast %207 : vector<4x1xi1> to vector<4x1xi1>
    %212 = vector.broadcast %211 : vector<4x1xi1> to vector<4x128xi1>
    %213 = arith.select %212, %203, %171 : vector<4x128xi1>, vector<4x128xf32>
    %214 = arith.maximumf %175, %205 : vector<4x128xf32>
    %215 = vector.shape_cast %207 : vector<4x1xi1> to vector<4x1xi1>
    %216 = vector.broadcast %215 : vector<4x1xi1> to vector<4x128xi1>
    %217 = arith.select %216, %214, %175 : vector<4x128xi1>, vector<4x128xf32>
    %c5_i32 = arith.constant 5 : i32
    %218 = arith.index_cast %c5_i32 : i32 to index
    %c0_37 = arith.constant 0 : index
    %c0_38 = arith.constant 0 : index
    %219 = vector.load %arg2[%218, %c0_37, %c0_38] : memref<8x4x512xf32, #tpu.memory_space<vmem>>, vector<1x4x512xf32>
    %220 = vector.shape_cast %219 : vector<1x4x512xf32> to vector<4x512xf32>
    %cst_39 = arith.constant dense<0.000000e+00> : vector<4x512xf32>
    %221 = tpu.matmul %210, %1, %cst_39 {dimension_numbers = #tpu.dot_dimension_numbers<[1], [0], [0], [1], [0, 0, 1, 1], [], []>} : vector<4x128xf32>, vector<128x512xf32>, vector<4x512xf32> -> vector<4x512xf32>
    %222 = arith.addf %220, %221 : vector<4x512xf32>
    %223 = vector.extract_strided_slice %222 {offsets = [0, 0], sizes = [4, 128], strides = [1, 1]} : vector<4x512xf32> to vector<4x128xf32>
    %224 = arith.negf %223 : vector<4x128xf32>
    %225 = math.exp %224 : vector<4x128xf32>
    %cst_40 = arith.constant 1.000000e+00 : f32
    %226 = vector.broadcast %cst_40 : f32 to vector<4x128xf32>
    %227 = arith.addf %226, %225 : vector<4x128xf32>
    %228 = arith.divf %226, %227 : vector<4x128xf32>
    %229 = vector.extract_strided_slice %222 {offsets = [0, 128], sizes = [4, 128], strides = [1, 1]} : vector<4x512xf32> to vector<4x128xf32>
    %230 = arith.negf %229 : vector<4x128xf32>
    %231 = math.exp %230 : vector<4x128xf32>
    %cst_41 = arith.constant 1.000000e+00 : f32
    %232 = vector.broadcast %cst_41 : f32 to vector<4x128xf32>
    %233 = arith.addf %232, %231 : vector<4x128xf32>
    %234 = arith.divf %232, %233 : vector<4x128xf32>
    %235 = vector.extract_strided_slice %222 {offsets = [0, 256], sizes = [4, 128], strides = [1, 1]} : vector<4x512xf32> to vector<4x128xf32>
    %236 = math.tanh %235 : vector<4x128xf32>
    %237 = vector.extract_strided_slice %222 {offsets = [0, 384], sizes = [4, 128], strides = [1, 1]} : vector<4x512xf32> to vector<4x128xf32>
    %238 = arith.negf %237 : vector<4x128xf32>
    %239 = math.exp %238 : vector<4x128xf32>
    %cst_42 = arith.constant 1.000000e+00 : f32
    %240 = vector.broadcast %cst_42 : f32 to vector<4x128xf32>
    %241 = arith.addf %240, %239 : vector<4x128xf32>
    %242 = arith.divf %240, %241 : vector<4x128xf32>
    %243 = arith.mulf %234, %213 : vector<4x128xf32>
    %244 = arith.mulf %228, %236 : vector<4x128xf32>
    %245 = arith.addf %243, %244 : vector<4x128xf32>
    %246 = math.tanh %245 : vector<4x128xf32>
    %247 = arith.mulf %242, %246 : vector<4x128xf32>
    %248 = vector.broadcast %c5_i32 : i32 to vector<4x1xi32>
    %249 = arith.cmpi slt, %248, %0 : vector<4x1xi32>
    %250 = vector.shape_cast %249 : vector<4x1xi1> to vector<4x1xi1>
    %251 = vector.broadcast %250 : vector<4x1xi1> to vector<4x128xi1>
    %252 = arith.select %251, %247, %210 : vector<4x128xi1>, vector<4x128xf32>
    %253 = vector.shape_cast %249 : vector<4x1xi1> to vector<4x1xi1>
    %254 = vector.broadcast %253 : vector<4x1xi1> to vector<4x128xi1>
    %255 = arith.select %254, %245, %213 : vector<4x128xi1>, vector<4x128xf32>
    %256 = arith.maximumf %217, %247 : vector<4x128xf32>
    %257 = vector.shape_cast %249 : vector<4x1xi1> to vector<4x1xi1>
    %258 = vector.broadcast %257 : vector<4x1xi1> to vector<4x128xi1>
    %259 = arith.select %258, %256, %217 : vector<4x128xi1>, vector<4x128xf32>
    %c6_i32 = arith.constant 6 : i32
    %260 = arith.index_cast %c6_i32 : i32 to index
    %c0_43 = arith.constant 0 : index
    %c0_44 = arith.constant 0 : index
    %261 = vector.load %arg2[%260, %c0_43, %c0_44] : memref<8x4x512xf32, #tpu.memory_space<vmem>>, vector<1x4x512xf32>
    %262 = vector.shape_cast %261 : vector<1x4x512xf32> to vector<4x512xf32>
    %cst_45 = arith.constant dense<0.000000e+00> : vector<4x512xf32>
    %263 = tpu.matmul %252, %1, %cst_45 {dimension_numbers = #tpu.dot_dimension_numbers<[1], [0], [0], [1], [0, 0, 1, 1], [], []>} : vector<4x128xf32>, vector<128x512xf32>, vector<4x512xf32> -> vector<4x512xf32>
    %264 = arith.addf %262, %263 : vector<4x512xf32>
    %265 = vector.extract_strided_slice %264 {offsets = [0, 0], sizes = [4, 128], strides = [1, 1]} : vector<4x512xf32> to vector<4x128xf32>
    %266 = arith.negf %265 : vector<4x128xf32>
    %267 = math.exp %266 : vector<4x128xf32>
    %cst_46 = arith.constant 1.000000e+00 : f32
    %268 = vector.broadcast %cst_46 : f32 to vector<4x128xf32>
    %269 = arith.addf %268, %267 : vector<4x128xf32>
    %270 = arith.divf %268, %269 : vector<4x128xf32>
    %271 = vector.extract_strided_slice %264 {offsets = [0, 128], sizes = [4, 128], strides = [1, 1]} : vector<4x512xf32> to vector<4x128xf32>
    %272 = arith.negf %271 : vector<4x128xf32>
    %273 = math.exp %272 : vector<4x128xf32>
    %cst_47 = arith.constant 1.000000e+00 : f32
    %274 = vector.broadcast %cst_47 : f32 to vector<4x128xf32>
    %275 = arith.addf %274, %273 : vector<4x128xf32>
    %276 = arith.divf %274, %275 : vector<4x128xf32>
    %277 = vector.extract_strided_slice %264 {offsets = [0, 256], sizes = [4, 128], strides = [1, 1]} : vector<4x512xf32> to vector<4x128xf32>
    %278 = math.tanh %277 : vector<4x128xf32>
    %279 = vector.extract_strided_slice %264 {offsets = [0, 384], sizes = [4, 128], strides = [1, 1]} : vector<4x512xf32> to vector<4x128xf32>
    %280 = arith.negf %279 : vector<4x128xf32>
    %281 = math.exp %280 : vector<4x128xf32>
    %cst_48 = arith.constant 1.000000e+00 : f32
    %282 = vector.broadcast %cst_48 : f32 to vector<4x128xf32>
    %283 = arith.addf %282, %281 : vector<4x128xf32>
    %284 = arith.divf %282, %283 : vector<4x128xf32>
    %285 = arith.mulf %276, %255 : vector<4x128xf32>
    %286 = arith.mulf %270, %278 : vector<4x128xf32>
    %287 = arith.addf %285, %286 : vector<4x128xf32>
    %288 = math.tanh %287 : vector<4x128xf32>
    %289 = arith.mulf %284, %288 : vector<4x128xf32>
    %290 = vector.broadcast %c6_i32 : i32 to vector<4x1xi32>
    %291 = arith.cmpi slt, %290, %0 : vector<4x1xi32>
    %292 = vector.shape_cast %291 : vector<4x1xi1> to vector<4x1xi1>
    %293 = vector.broadcast %292 : vector<4x1xi1> to vector<4x128xi1>
    %294 = arith.select %293, %289, %252 : vector<4x128xi1>, vector<4x128xf32>
    %295 = vector.shape_cast %291 : vector<4x1xi1> to vector<4x1xi1>
    %296 = vector.broadcast %295 : vector<4x1xi1> to vector<4x128xi1>
    %297 = arith.select %296, %287, %255 : vector<4x128xi1>, vector<4x128xf32>
    %298 = arith.maximumf %259, %289 : vector<4x128xf32>
    %299 = vector.shape_cast %291 : vector<4x1xi1> to vector<4x1xi1>
    %300 = vector.broadcast %299 : vector<4x1xi1> to vector<4x128xi1>
    %301 = arith.select %300, %298, %259 : vector<4x128xi1>, vector<4x128xf32>
    %c7_i32 = arith.constant 7 : i32
    %302 = arith.index_cast %c7_i32 : i32 to index
    %c0_49 = arith.constant 0 : index
    %c0_50 = arith.constant 0 : index
    %303 = vector.load %arg2[%302, %c0_49, %c0_50] : memref<8x4x512xf32, #tpu.memory_space<vmem>>, vector<1x4x512xf32>
    %304 = vector.shape_cast %303 : vector<1x4x512xf32> to vector<4x512xf32>
    %cst_51 = arith.constant dense<0.000000e+00> : vector<4x512xf32>
    %305 = tpu.matmul %294, %1, %cst_51 {dimension_numbers = #tpu.dot_dimension_numbers<[1], [0], [0], [1], [0, 0, 1, 1], [], []>} : vector<4x128xf32>, vector<128x512xf32>, vector<4x512xf32> -> vector<4x512xf32>
    %306 = arith.addf %304, %305 : vector<4x512xf32>
    %307 = vector.extract_strided_slice %306 {offsets = [0, 0], sizes = [4, 128], strides = [1, 1]} : vector<4x512xf32> to vector<4x128xf32>
    %308 = arith.negf %307 : vector<4x128xf32>
    %309 = math.exp %308 : vector<4x128xf32>
    %cst_52 = arith.constant 1.000000e+00 : f32
    %310 = vector.broadcast %cst_52 : f32 to vector<4x128xf32>
    %311 = arith.addf %310, %309 : vector<4x128xf32>
    %312 = arith.divf %310, %311 : vector<4x128xf32>
    %313 = vector.extract_strided_slice %306 {offsets = [0, 128], sizes = [4, 128], strides = [1, 1]} : vector<4x512xf32> to vector<4x128xf32>
    %314 = arith.negf %313 : vector<4x128xf32>
    %315 = math.exp %314 : vector<4x128xf32>
    %cst_53 = arith.constant 1.000000e+00 : f32
    %316 = vector.broadcast %cst_53 : f32 to vector<4x128xf32>
    %317 = arith.addf %316, %315 : vector<4x128xf32>
    %318 = arith.divf %316, %317 : vector<4x128xf32>
    %319 = vector.extract_strided_slice %306 {offsets = [0, 256], sizes = [4, 128], strides = [1, 1]} : vector<4x512xf32> to vector<4x128xf32>
    %320 = math.tanh %319 : vector<4x128xf32>
    %321 = vector.extract_strided_slice %306 {offsets = [0, 384], sizes = [4, 128], strides = [1, 1]} : vector<4x512xf32> to vector<4x128xf32>
    %322 = arith.negf %321 : vector<4x128xf32>
    %323 = math.exp %322 : vector<4x128xf32>
    %cst_54 = arith.constant 1.000000e+00 : f32
    %324 = vector.broadcast %cst_54 : f32 to vector<4x128xf32>
    %325 = arith.addf %324, %323 : vector<4x128xf32>
    %326 = arith.divf %324, %325 : vector<4x128xf32>
    %327 = arith.mulf %318, %297 : vector<4x128xf32>
    %328 = arith.mulf %312, %320 : vector<4x128xf32>
    %329 = arith.addf %327, %328 : vector<4x128xf32>
    %330 = math.tanh %329 : vector<4x128xf32>
    %331 = arith.mulf %326, %330 : vector<4x128xf32>
    %332 = vector.broadcast %c7_i32 : i32 to vector<4x1xi32>
    %333 = arith.cmpi slt, %332, %0 : vector<4x1xi32>
    %334 = vector.shape_cast %333 : vector<4x1xi1> to vector<4x1xi1>
    %335 = vector.broadcast %334 : vector<4x1xi1> to vector<4x128xi1>
    %336 = arith.select %335, %331, %294 : vector<4x128xi1>, vector<4x128xf32>
    %337 = vector.shape_cast %333 : vector<4x1xi1> to vector<4x1xi1>
    %338 = vector.broadcast %337 : vector<4x1xi1> to vector<4x128xi1>
    %339 = arith.select %338, %329, %297 : vector<4x128xi1>, vector<4x128xf32>
    %340 = arith.maximumf %301, %331 : vector<4x128xf32>
    %341 = vector.shape_cast %333 : vector<4x1xi1> to vector<4x1xi1>
    %342 = vector.broadcast %341 : vector<4x1xi1> to vector<4x128xi1>
    %343 = arith.select %342, %340, %301 : vector<4x128xi1>, vector<4x128xf32>
    %c8_i32 = arith.constant 8 : i32
    %c0_55 = arith.constant 0 : index
    %c0_56 = arith.constant 0 : index
    %344 = vector.load %arg4[%c0_55, %c0_56] : memref<4x128xf32, #tpu.memory_space<vmem>>, vector<4x128xf32>
    tpu.vector_store %arg4[%c0_55, %c0_56], %343 {strides = array<i32>} : memref<4x128xf32, #tpu.memory_space<vmem>>, vector<4x128xf32>,
    return
  }
}

</mosaic_0001>

<bundles_post_ra>
// kernel: encoder_forward.1
= control target key start
LH: loop header
LB: loop body
LE: loop exit
PB: predicated region body
PF: predicated region fallthrough
CT: control target
= control target key end

     0   :  { %v3291_v4 = vmov 0.0   ;;  %v1922_v7 = vmov 0   ;;  %s3286_s0 = inlined_call_operand.vmem [shape: s32[4,1], index: 0, kind: input, shape index: {}]   ;;  %s3287_s1 = inlined_call_operand.vmem [shape: f32[4,1], index: 1, kind: input, shape index: {}]   ;;  %s3288_s2 = inlined_call_operand.vmem [shape: f32[8,4,512], index: 2, kind: input, shape index: {}]   ;;  %s3289_s3 = inlined_call_operand.vmem [shape: f32[128,512], index: 3, kind: input, shape index: {}]   ;;  %s3290_s4 = inlined_call_operand.hbm [shape: f32[4,128], index: 4, kind: output, shape index: {}]  }
   0x1   :  { %v1952_v0 = vld [vmem:[%s3289_s3 + $0x1e8] sm:$0xff]  ;;  %v1957_v1 = vld [vmem:[%s3289_s3 + $0x1e0] sm:$0xff]  ;;  %156 = vmatprep.mubr.f32.mxu0 %v3291_v4  ;;  %227 = vmatprep.mubr.f32.mxu1 %v3291_v4  ;;  %v2001_v10 = vld [vmem:[%s3289_s3 + $0x1f8] sm:$0xff] }
   0x2   :  { %3380 = vst [vmem:[#allocation5_spill] sm:$0xff] %v1952_v0  ;;  %v1962_v2 = vld [vmem:[%s3289_s3 + $0x1c8] sm:$0xff]  ;;  %92 = vmatprep.subr.mxu0 %v1952_v0  ;;  %v1968_v3 = vld [vmem:[%s3289_s3 + $0x1c0] sm:$0xff]  ;;  %1705 = vset.pattern.permute.xlu0 %v1922_v7  ;;  %3381 = vst [vmem:[#allocation6_spill] sm:$0xff] %v2001_v10 }
   0x3   :  { %93 = vmatpush1.msra.mxu0 %v1957_v1  ;;  %v1975_v5 = vld [vmem:[%s3289_s3 + $0x1a8] sm:$0xff]  ;;  %v1982_v6 = vld [vmem:[%s3289_s3 + $0x1a0] sm:$0xff]  ;;  %1706 = vset.pattern.permute.xlu1 %v1922_v7  ;;  %v2013_v12 = vld [vmem:[%s3289_s3 + $0x1f0] sm:$0xff] }
   0x4   :  { %94 = vmatprep.subr.mxu0 %v1962_v2  ;;  %v1989_v8 = vld [vmem:[%s3289_s3 + $0x188] sm:$0xff]  ;;  %v1996_v9 = vld [vmem:[%s3289_s3 + $0x180] sm:$0xff]  ;;  %163 = vmatprep.subr.mxu1 %v2001_v10  ;;  %v2025_v14 = vld [vmem:[%s3289_s3 + $0x1d8] sm:$0xff] }
   0x5   :  { %95 = vmatpush1.msra.mxu0 %v1968_v3  ;;  %v2007_v11 = vld [vmem:[%s3289_s3 + $0x168] sm:$0xff]  ;;  %v2019_v13 = vld [vmem:[%s3289_s3 + $0x160] sm:$0xff]  ;;  %164 = vmatpush1.msra.mxu1 %v2013_v12  ;;  %v2030_v15 = vld [vmem:[%s3289_s3 + $0x1d0] sm:$0xff] }
   0x6   :  { %96 = vmatprep.subr.mxu0 %v1975_v5  ;;  %v2036_v16 = vld [vmem:[%s3289_s3 + $0x148] sm:$0xff]  ;;  %165 = vmatprep.subr.mxu1 %v2025_v14  ;;  %v2042_v17 = vld [vmem:[%s3289_s3 + $0x1b8] sm:$0xff]  ;;  %v2048_v18 = vld [vmem:[%s3289_s3 + $0x140] sm:$0xff] }
   0x7   :  { %97 = vmatpush1.msra.mxu0 %v1982_v6  ;;  %166 = vmatpush1.msra.mxu1 %v2030_v15  ;;  %v2054_v19 = vld [vmem:[%s3289_s3 + $0x1b0] sm:$0xff]  ;;  %v2059_v20 = vld [vmem:[%s3289_s3 + $0x198] sm:$0xff]  ;;  %v2065_v21 = vld [vmem:[%s3289_s3 + $0x128] sm:$0xff] }
   0x8   :  { %98 = vmatprep.subr.mxu0 %v1989_v8  ;;  %167 = vmatprep.subr.mxu1 %v2042_v17  ;;  %v2071_v22 = vld [vmem:[%s3289_s3 + $0x190] sm:$0xff]  ;;  %v2077_v23 = vld [vmem:[%s3289_s3 + $0x120] sm:$0xff]  ;;  %v2083_v24 = vld [vmem:[%s3289_s3 + $0x178] sm:$0xff] }
   0x9   :  { %99 = vmatpush1.msra.mxu0 %v1996_v9  ;;  %168 = vmatpush1.msra.mxu1 %v2054_v19  ;;  %v2089_v25 = vld [vmem:[%s3289_s3 + $0x108] sm:$0xff]  ;;  %v2095_v26 = vld [vmem:[%s3289_s3 + $0x170] sm:$0xff]  ;;  %v2101_v27 = vld [vmem:[%s3289_s3 + $0x100] sm:$0xff] }
   0xa   :  { %100 = vmatprep.subr.mxu0 %v2007_v11  ;;  %169 = vmatprep.subr.mxu1 %v2059_v20  ;;  %v2107_v28 = vld [vmem:[%s3289_s3 + $0x158] sm:$0xff]  ;;  %v2113_v29 = vld [vmem:[%s3289_s3 + $0xe8] sm:$0xff]  ;;  %v2119_v30 = vld [vmem:[%s3289_s3 + $0x150] sm:$0xff] }
   0xb   :  { %101 = vmatpush1.msra.mxu0 %v2019_v13  ;;  %170 = vmatpush1.msra.mxu1 %v2071_v22  ;;  %v2125_v31 = vld [vmem:[%s3289_s3 + $0xe0] sm:$0xff]  ;;  %v2131_v32 = vld [vmem:[%s3289_s3 + $0x138] sm:$0xff]  ;;  %v2137_v33 = vld [vmem:[%s3289_s3 + $0xc8] sm:$0xff] }
   0xc   :  { %102 = vmatprep.subr.mxu0 %v2036_v16  ;;  %171 = vmatprep.subr.mxu1 %v2083_v24  ;;  %v2143_v34 = vld [vmem:[%s3289_s3 + $0x130] sm:$0xff]  ;;  %v2149_v35 = vld [vmem:[%s3289_s3 + $0xc0] sm:$0xff]  ;;  %v2155_v36 = vld [vmem:[%s3289_s3 + $0x118] sm:$0xff] }
   0xd   :  { %103 = vmatpush1.msra.mxu0 %v2048_v18  ;;  %172 = vmatpush1.msra.mxu1 %v2095_v26  ;;  %v2161_v37 = vld [vmem:[%s3289_s3 + $0xa8] sm:$0xff]  ;;  %v2167_v38 = vld [vmem:[%s3289_s3 + $0x110] sm:$0xff]  ;;  %v2173_v39 = vld [vmem:[%s3289_s3 + $0xa0] sm:$0xff] }
   0xe   :  { %104 = vmatprep.subr.mxu0 %v2065_v21  ;;  %173 = vmatprep.subr.mxu1 %v2107_v28  ;;  %v2179_v40 = vld [vmem:[%s3289_s3 + $0xf8] sm:$0xff]  ;;  %v2185_v41 = vld [vmem:[%s3289_s3 + $0x88] sm:$0xff]  ;;  %v2191_v42 = vld [vmem:[%s3289_s3 + $0xf0] sm:$0xff] }
   0xf   :  { %105 = vmatpush1.msra.mxu0 %v2077_v23  ;;  %174 = vmatpush1.msra.mxu1 %v2119_v30  ;;  %v2197_v43 = vld [vmem:[%s3289_s3 + $0x80] sm:$0xff]  ;;  %v2203_v44 = vld [vmem:[%s3289_s3 + $0xd8] sm:$0xff]  ;;  %v2209_v45 = vld [vmem:[%s3289_s3 + $0x68] sm:$0xff] }
  0x10   :  { %106 = vmatprep.subr.mxu0 %v2089_v25  ;;  %175 = vmatprep.subr.mxu1 %v2131_v32  ;;  %3382 = vst [vmem:[#allocation7_spill] sm:$0xff] %v2197_v43  ;;  %3383 = vst [vmem:[#allocation8_spill] sm:$0xff] %v2209_v45  ;;  %v2215_v46 = vld [vmem:[%s3289_s3 + $0xd0] sm:$0xff] }
  0x11   :  { %107 = vmatpush1.msra.mxu0 %v2101_v27  ;;  %176 = vmatpush1.msra.mxu1 %v2143_v34 }
  0x12   :  { %108 = vmatprep.subr.mxu0 %v2113_v29  ;;  %177 = vmatprep.subr.mxu1 %v2155_v36 }
  0x13   :  { %109 = vmatpush1.msra.mxu0 %v2125_v31  ;;  %178 = vmatpush1.msra.mxu1 %v2167_v38 }
  0x14   :  { %110 = vmatprep.subr.mxu0 %v2137_v33  ;;  %179 = vmatprep.subr.mxu1 %v2179_v40 }
  0x15   :  { %111 = vmatpush1.msra.mxu0 %v2149_v35 }
  0x16   :  { %112 = vmatprep.subr.mxu0 %v2161_v37 }
  0x17   :  { %113 = vmatpush1.msra.mxu0 %v2173_v39 }
  0x18   :  { %9 = vsyncpa [#allocation3], 0  ;;  %114 = vmatprep.subr.mxu0 %v2185_v41  ;;  %v2221_v47 = vld [vmem:[%s3289_s3 + $0x60] sm:$0xff]  ;;  %180 = vmatpush1.msra.mxu1 %v2191_v42  ;;  %v2227_v48 = vld [vmem:[%s3289_s3 + $0xb8] sm:$0xff] }
  0x19   :  { %3384 = vst [vmem:[#allocation9_spill] sm:$0xff] %v2221_v47  ;;  %115 = vmatpush1.msra.mxu0 %v2197_v43  ;;  %v2233_v49 = vld [vmem:[%s3289_s3 + $0x48] sm:$0xff]  ;;  %181 = vmatprep.subr.mxu1 %v2203_v44  ;;  %v2239_v50 = vld [vmem:[%s3289_s3 + $0xb0] sm:$0xff]  ;;  %v2245_v51 = vld [vmem:[%s3289_s3 + $0x40] sm:$0xff] }
  0x1a   :  { %3385 = vst [vmem:[#allocation10_spill] sm:$0xff] %v2233_v49  ;;  %116 = vmatprep.subr.mxu0 %v2209_v45  ;;  %3386 = vst [vmem:[#allocation11_spill] sm:$0xff] %v2245_v51  ;;  %182 = vmatpush1.msra.mxu1 %v2215_v46  ;;  %v2251_v52 = vld [vmem:[%s3289_s3 + $0x98] sm:$0xff]  ;;  %v2256_v53 = vld [vmem:[%s3286_s0] sm:$0xf] }
  0x1b   :  { %3387 = vst [vmem:[#allocation12_spill] sm:$0xff] %v2251_v52  ;;  %117 = vmatpush1.msra.mxu0 %v2221_v47  ;;  %v2262_v54 = vld [vmem:[%s3289_s3 + $0x28] sm:$0xff]  ;;  %183 = vmatprep.subr.mxu1 %v2227_v48  ;;  %v2268_v55 = vld [vmem:[%s3289_s3 + $0x90] sm:$0xff]  ;;  %v2274_v56 = vld [vmem:[%s3289_s3 + $0x20] sm:$0xff]  ;;  %vm274_vm0 = vcmp.gt.s32.totalorder %v2256_v53, 0  ;;  %vm664_vm1 = vcmp.gt.s32.totalorder %v2256_v53, 2 }
  0x1c   :  { %3388 = vst [vmem:[#allocation13_spill] sm:$0xff] %v2262_v54  ;;  %3389 = vst [vmem:[#allocation14_spill] sm:$0xff] %v2268_v55  ;;  %118 = vmatprep.subr.mxu0 %v2233_v49  ;;  %184 = vmatpush1.msra.mxu1 %v2239_v50  ;;  %v2280_v57 = vld [vmem:[%s3289_s3 + $0x78] sm:$0xff]  ;;  %v2286_v58 = vld [vmem:[%s3289_s3 + $0x8] sm:$0xff]  ;;  %v275_v4 = vsel %vm274_vm0, 1, %v1922_v7  ;;  %vm469_vm2 = vcmp.gt.s32.totalorder %v2256_v53, 1 }
  0x1d   :  { %3390 = vst [vmem:[#allocation15_spill] sm:$0xff] %v2274_v56  ;;  %3391 = vst [vmem:[#allocation16_spill] sm:$0xff] %v2280_v57  ;;  %119 = vmatpush1.msra.mxu0 %v2245_v51  ;;  %185 = vmatprep.subr.mxu1 %v2251_v52  ;;  %v2292_v59 = vld [vmem:[%s3289_s3 + $0x70] sm:$0xff]  ;;  %v2299_v60 = vld [vmem:[%s3289_s3] sm:$0xff]  ;;  %vm859_vm3 = vcmp.gt.s32.totalorder %v2256_v53, 3  ;;  %vm1054_vm4 = vcmp.gt.s32.totalorder %v2256_v53, 4 }
  0x1e   :  { %3392 = vst [vmem:[#allocation17_spill] sm:$0xff] %v2286_v58  ;;  %3393 = vst [vmem:[#allocation18_spill] sm:$0xff] %v2292_v59  ;;  %120 = vmatprep.subr.mxu0 %v2262_v54  ;;  %186 = vmatpush1.msra.mxu1 %v2268_v55  ;;  %v2305_v61 = vld [vmem:[%s3289_s3 + $0x58] sm:$0xff]  ;;  %v2313_v62 = vld [vmem:[%s3289_s3 + $0x50] sm:$0xff]  ;;  %v3399_v54 = vmov 0.0   ;;  %vm1249_vm5 = vcmp.gt.s32.totalorder %v2256_v53, 5 }
  0x1f   :  { %3394 = vst [vmem:[#allocation19_spill] sm:$0xff] %v2299_v60  ;;  %3395 = vst [vmem:[#allocation20_spill] sm:$0xff] %v2305_v61  ;;  %121 = vmatpush1.msra.mxu0 %v2274_v56  ;;  %187 = vmatprep.subr.mxu1 %v2280_v57  ;;  %v2320_v63 = vld [vmem:[%s3289_s3 + $0x38] sm:$0xff]  ;;  %v2328_v56 = vld [vmem:[%s3289_s3 + $0x30] sm:$0xff]  ;;  %vm1444_vm6 = vcmp.gt.s32.totalorder %v2256_v53, 6  ;;  %vm1639_vm7 = vcmp.gt.s32.totalorder %v2256_v53, 7 }
  0x20   :  { %3396 = vst [vmem:[#allocation21_spill] sm:$0xff] %v2313_v62  ;;  %122 = vmatprep.subr.mxu0 %v2286_v58  ;;  %188 = vmatpush1.msra.mxu1 %v2292_v59  ;;  %3397 = vst [vmem:[#allocation22_spill] sm:$0xff] %v2320_v63  ;;  %v665_v58 = vsel %vm664_vm1, 1, %v1922_v7  ;;  %v2337_v51 = vld [vmem:[%s3289_s3 + $0x18] sm:$0xff] }
  0x21   :  { %123 = vmatpush1.msra.mxu0 %v2299_v60  ;;  %189 = vmatprep.subr.mxu1 %v2305_v61  ;;  %3398 = vst [vmem:[#allocation23_spill] sm:$0xff] %v2328_v56  ;;  %3400 = vst [vmem:[#allocation24_spill] sm:$0xff] %v2337_v51  ;;  %v2344_v60 = vld [vmem:[%s3289_s3 + $0x10] sm:$0xff]  ;;  %v470_v61 = vsel %vm469_vm2, 1, %v1922_v7 }
  0x22   :  { %157 = vmatmul.mubr.f32.vlgmr.msra.gmra.mxu0 %v3399_v54  ;;  %190 = vmatpush1.msra.mxu1 %v2313_v62  ;;  %3401 = vst [vmem:[#allocation25_spill] sm:$0xff] %v2344_v60  ;;  %v860_v62 = vsel %vm859_vm3, 1, %v1922_v7  ;;  %v3403_v53 = vld [vmem:[#allocation11_spill] sm:$0xff] }
  0x23   :  { %191 = vmatprep.subr.mxu1 %v2320_v63  ;;  %277 = vperm.xlu0 %1705, %v275_v4   ;;  %v1055_v4 = vsel %vm1054_vm4, 1, %v1922_v7 }
  0x24   :  { %192 = vmatpush1.msra.mxu1 %v2328_v56  ;;  %667 = vperm.xlu1 %1706, %v665_v58   ;;  %v1250_v58 = vsel %vm1249_vm5, 1, %v1922_v7 }
  0x25   :  { %193 = vmatprep.subr.mxu1 %v2337_v51  ;;  %287 = vmatprep.subr.mxu0 %v1952_v0 }
  0x26   :  { %194 = vmatpush1.msra.mxu1 %v2344_v60  ;;  %288 = vmatpush1.msra.mxu0 %v1957_v1 }
  0x27   :  { %228 = vmatmul.mubr.f32.vlgmr.msra.gmra.mxu1 %v3399_v54  ;;  %472 = vperm.xlu0 %1705, %v470_v61   ;;  %v1445_v61 = vsel %vm1444_vm6, 1, %v1922_v7 }
  0x28   :  { %862 = vperm.xlu1 %1706, %v860_v62   ;;  %358 = vmatprep.subr.mxu1 %v2001_v10  ;;  %v83_v62 = vld [vmem:[%s3287_s1] sm:$0xf] }
  0x29   :  { %359 = vmatpush1.msra.mxu1 %v2013_v12  ;;  %289 = vmatprep.subr.mxu0 %v1962_v2 }
  0x2a   :  { %360 = vmatprep.subr.mxu1 %v2025_v14  ;;  %290 = vmatpush1.msra.mxu0 %v1968_v3 }
  0x2b   :  { %1057 = vperm.xlu0 %1705, %v1055_v4   ;;  %361 = vmatpush1.msra.mxu1 %v2030_v15  ;;  %v1641_v4 = vsel %vm1639_vm7, 1, %v1922_v7  ;;  %v3402_v7 = vld [vmem:[#allocation20_spill] sm:$0xff] }
  0x2c   :  { %1252 = vperm.xlu1 %1706, %v1250_v58   ;;  %291 = vmatprep.subr.mxu0 %v1975_v5  ;;  %v3404_v58 = vld [vmem:[#allocation21_spill] sm:$0xff] }
  0x2d   :  { %362 = vmatprep.subr.mxu1 %v2042_v17  ;;  %292 = vmatpush1.msra.mxu0 %v1982_v6 }
  0x2e   :  { %363 = vmatpush1.msra.mxu1 %v2054_v19  ;;  %293 = vmatprep.subr.mxu0 %v1989_v8 }
  0x2f   :  { %1447 = vperm.xlu0 %1705, %v1445_v61   ;;  %364 = vmatprep.subr.mxu1 %v2059_v20  ;;  %v3405_v61 = vld [vmem:[#allocation13_spill] sm:$0xff] }
  0x30   :  { %86 = vperm.xlu1 %1706, %v83_v62   ;;  %294 = vmatpush1.msra.mxu0 %v1996_v9  ;;  %v3406_v62 = vld [vmem:[#allocation15_spill] sm:$0xff] }
  0x31   :  { %365 = vmatpush1.msra.mxu1 %v2071_v22  ;;  %295 = vmatprep.subr.mxu0 %v2007_v11 }
  0x32   :  { %366 = vmatprep.subr.mxu1 %v2083_v24  ;;  %296 = vmatpush1.msra.mxu0 %v2019_v13 }
  0x33   :  { %1643 = vperm.xlu0 %1705, %v1641_v4   ;;  %367 = vmatpush1.msra.mxu1 %v2095_v26  ;;  %v3407_v4 = vld [vmem:[#allocation17_spill] sm:$0xff] }
  0x34   :  { %297 = vmatprep.subr.mxu0 %v2036_v16  ;;  %368 = vmatprep.subr.mxu1 %v2107_v28 }
  0x35   :  { %298 = vmatpush1.msra.mxu0 %v2048_v18  ;;  %369 = vmatpush1.msra.mxu1 %v2119_v30 }
  0x36   :  { %299 = vmatprep.subr.mxu0 %v2065_v21  ;;  %370 = vmatprep.subr.mxu1 %v2131_v32 }
  0x37   :  { %300 = vmatpush1.msra.mxu0 %v2077_v23  ;;  %371 = vmatpush1.msra.mxu1 %v2143_v34 }
  0x38   :  { %301 = vmatprep.subr.mxu0 %v2089_v25  ;;  %372 = vmatprep.subr.mxu1 %v2155_v36 }
  0x39   :  { %302 = vmatpush1.msra.mxu0 %v2101_v27  ;;  %373 = vmatpush1.msra.mxu1 %v2167_v38 }
  0x3a   :  { %303 = vmatprep.subr.mxu0 %v2113_v29  ;;  %374 = vmatprep.subr.mxu1 %v2179_v40 }
  0x3b   :  { %304 = vmatpush1.msra.mxu0 %v2125_v31  ;;  %375 = vmatpush1.msra.mxu1 %v2191_v42 }
  0x3c   :  { %305 = vmatprep.subr.mxu0 %v2137_v33  ;;  %376 = vmatprep.subr.mxu1 %v2203_v44 }
  0x3d   :  { %306 = vmatpush1.msra.mxu0 %v2149_v35  ;;  %377 = vmatpush1.msra.mxu1 %v2215_v46 }
  0x3e   :  { %307 = vmatprep.subr.mxu0 %v2161_v37  ;;  %378 = vmatprep.subr.mxu1 %v2227_v48 }
  0x3f   :  { %308 = vmatpush1.msra.mxu0 %v2173_v39  ;;  %379 = vmatpush1.msra.mxu1 %v2239_v50 }
  0x40   :  { %309 = vmatprep.subr.mxu0 %v2185_v41  ;;  %380 = vmatprep.subr.mxu1 %v2251_v52 }
  0x41   :  { %310 = vmatpush1.msra.mxu0 %v2197_v43  ;;  %381 = vmatpush1.msra.mxu1 %v2268_v55 }
  0x42   :  { %311 = vmatprep.subr.mxu0 %v2209_v45  ;;  %382 = vmatprep.subr.mxu1 %v2280_v57 }
  0x43   :  { %312 = vmatpush1.msra.mxu0 %v2221_v47  ;;  %383 = vmatpush1.msra.mxu1 %v2292_v59  ;;  %v3408_v59 = vld [vmem:[#allocation19_spill] sm:$0xff] }
  0x44   :  { %313 = vmatprep.subr.mxu0 %v2233_v49  ;;  %384 = vmatprep.subr.mxu1 %v3402_v7 }
  0x45   :  { %314 = vmatpush1.msra.mxu0 %v3403_v53  ;;  %385 = vmatpush1.msra.mxu1 %v3404_v58 }
  0x46   :  { %315 = vmatprep.subr.mxu0 %v3405_v61  ;;  %386 = vmatprep.subr.mxu1 %v2320_v63 }
  0x47   :  { %316 = vmatpush1.msra.mxu0 %v3406_v62  ;;  %387 = vmatpush1.msra.mxu1 %v2328_v56  ;;  %v90_v56 = vld [vmem:[%s3288_s2] sm:$0xff] }
  0x48   :  { %317 = vmatprep.subr.mxu0 %v3407_v4  ;;  %388 = vmatprep.subr.mxu1 %v2337_v51 }
  0x49   :  { %318 = vmatpush1.msra.mxu0 %v3408_v59  ;;  %351 = vmatprep.mubr.f32.mxu0 %v3399_v54 }
  0x4a   :  { %389 = vmatpush1.msra.mxu1 %v2344_v60  ;;  %422 = vmatprep.mubr.f32.mxu1 %v3399_v54 }
  0x4b   :  { %482 = vmatprep.subr.mxu0 %v1952_v0  ;;  %553 = vmatprep.subr.mxu1 %v2001_v10  ;;  %v91_v0 = vld [vmem:[%s3288_s2 + $0x8] sm:$0xff] }
  0xe2   :  { %v158_v63 = vpop.f32.mrf.mxu0 }
  0xe4   :  { %v160_v4 = vpop.f32.mrf.mxu0 }
  0xe5   :  { %v238_v62 = vcombine.low %v158_v63, %v160_v4 }
  0xe7   :  { %v242_v51 = vadd.f32 %v238_v62, %v90_v56  ;;  %v229_v61 = vpop.f32.mrf.mxu1  ;;  %v2437_v62 = vpop.permute.xlu1 %667 }
  0xe8   :  { %3409 = vst [vmem:[#allocation26_spill] sm:$0xff] %v2437_v62  ;;  %v3426_v62 = vld [vmem:[#allocation19_spill] sm:$0xff] }
  0xe9   :  { %v1662_v59 = vmul.f32 -1.442695, %v242_v51  ;;  %v251_v58 = vrot.slane %v242_v51, 4  ;;  %v231_v53 = vpop.f32.mrf.mxu1 }
  0xea   :  { %v239_v7 = vcombine.low %v229_v61, %v231_v53  ;;  %v278_v53 = vpop.permute.xlu0 %277 }
  0xeb   :  { %1707 = vpow2.f32 %v1662_v59  ;;  %v1663_v60 = vmul.f32 -1.442695, %v251_v58  ;;  %vm279_vm8 = vcmp.eq.s32.totalorder %v278_v53, 1  ;;  %v3413_v53 = vld [vmem:[#allocation16_spill] sm:$0xff] }
  0xec   :  { %v243_v10 = vadd.f32 %v239_v7, %v91_v0 }
  0xed   :  { %1709 = vpow2.f32 %v1663_v60 }
  0xee   :  { %v261_v54 = vrot.slane %v243_v10, 4 }
  0xf0   :  { %v1664_v49 = vmul.f32 -1.442695, %v261_v54 }
  0xf2   :  { %1711 = vpow2.f32 %v1664_v49 }
  0xf8   :  { %v1708_v47 = vpop.eup %1707 }
  0xf9   :  { %v247_v57 = vadd.f32 1.0, %v1708_v47 }
  0xfa   :  { %v1710_v45 = vpop.eup %1709 }
  0xfb   :  { %1713 = vrcp.f32 %v247_v57  ;;  %v256_v56 = vadd.f32 1.0, %v1710_v45  ;;  %v2442_v45 = vpop.permute.xlu1 %862 }
  0xfc   :  { %1715 = vtanh.f32 %v243_v10  ;;  %3410 = vst [vmem:[#allocation27_spill] sm:$0xff] %v2442_v45  ;;  %v3425_v45 = vld [vmem:[#allocation24_spill] sm:$0xff] }
  0xfd   :  { %1717 = vrcp.f32 %v256_v56 }
  0xff   :  { %v1712_v51 = vpop.eup %1711  ;;  %v2444_v10 = vpop.permute.xlu1 %1252 }
 0x100   :  { %v266_v61 = vadd.f32 1.0, %v1712_v51  ;;  %3411 = vst [vmem:[#allocation28_spill] sm:$0xff] %v2444_v10  ;;  %v3424_v10 = vld [vmem:[#allocation17_spill] sm:$0xff] }
 0x102   :  { %1719 = vrcp.f32 %v266_v61  ;;  %v3415_v61 = vld [vmem:[#allocation18_spill] sm:$0xff] }
 0x103   :  { %v87_v7 = vpop.permute.xlu1 %86 }
 0x108   :  { %v1714_v63 = vpop.eup %1713 }
 0x109   :  { %v1716_v59 = vpop.eup %1715 }
 0x10a   :  { %v1718_v58 = vpop.eup %1717  ;;  %v270_v0 = vmul.f32 %v1716_v59, %v1714_v63  ;;  %v3412_v59 = vld [vmem:[#allocation8_spill] sm:$0xff] }
 0x10b   :  { %v269_v60 = vmul.f32 0.0, %v1718_v58  ;;  %v3414_v58 = vld [vmem:[#allocation9_spill] sm:$0xff] }
 0x10d   :  { %v271_v54 = vadd.f32 %v270_v0, %v269_v60  ;;  %v3416_v60 = vld [vmem:[#allocation10_spill] sm:$0xff]  ;;  %v3417_v0 = vld [vmem:[#allocation20_spill] sm:$0xff] }
 0x10f   :  { %1721 = vtanh.f32 %v271_v54  ;;  %v2440_v47 = vsel %vm279_vm8, %v271_v54, 0.0  ;;  %v1720_v49 = vpop.eup %1719  ;;  %v3418_v54 = vld [vmem:[#allocation11_spill] sm:$0xff] }
 0x11c   :  { %v1722_v57 = vpop.eup %1721 }
 0x11d   :  { %v273_v4 = vmul.f32 %v1722_v57, %v1720_v49  ;;  %v3419_v49 = vld [vmem:[#allocation21_spill] sm:$0xff] }
 0x11e   :  { %v3420_v57 = vld [vmem:[#allocation13_spill] sm:$0xff] }
 0x11f   :  { %v282_v56 = vmax.f32 %v87_v7, %v273_v4  ;;  %1667 = vmatmul.mubr.msk.f32.vlgmr.msra.gmra.mxu0 %vm279_vm8, %v273_v4  ;;  %1668 = vmatmul.mubr.msk.f32.vlgmr.msra.gmra.mxu1 %vm279_vm8, %v273_v4  ;;  %v2449_v51 = vsel %vm279_vm8, %v273_v4, 0.0  ;;  %v3422_v4 = vld [vmem:[#allocation15_spill] sm:$0xff] }
 0x120   :  { %483 = vmatpush1.msra.mxu0 %v1957_v1  ;;  %554 = vmatpush1.msra.mxu1 %v2013_v12 }
 0x121   :  { %v2454_v63 = vsel %vm279_vm8, %v282_v56, %v87_v7  ;;  %484 = vmatprep.subr.mxu0 %v1962_v2  ;;  %555 = vmatprep.subr.mxu1 %v2025_v14  ;;  %v3421_v7 = vld [vmem:[#allocation22_spill] sm:$0xff]  ;;  %v3423_v56 = vld [vmem:[#allocation23_spill] sm:$0xff] }
 0x122   :  { %485 = vmatpush1.msra.mxu0 %v1968_v3  ;;  %556 = vmatpush1.msra.mxu1 %v2030_v15 }
 0x123   :  { %486 = vmatprep.subr.mxu0 %v1975_v5  ;;  %557 = vmatprep.subr.mxu1 %v2042_v17 }
 0x124   :  { %487 = vmatpush1.msra.mxu0 %v1982_v6  ;;  %558 = vmatpush1.msra.mxu1 %v2054_v19 }
 0x125   :  { %488 = vmatprep.subr.mxu0 %v1989_v8  ;;  %559 = vmatprep.subr.mxu1 %v2059_v20 }
 0x126   :  { %489 = vmatpush1.msra.mxu0 %v1996_v9  ;;  %560 = vmatpush1.msra.mxu1 %v2071_v22 }
 0x127   :  { %490 = vmatprep.subr.mxu0 %v2007_v11  ;;  %561 = vmatprep.subr.mxu1 %v2083_v24 }
 0x128   :  { %491 = vmatpush1.msra.mxu0 %v2019_v13  ;;  %562 = vmatpush1.msra.mxu1 %v2095_v26 }
 0x129   :  { %492 = vmatprep.subr.mxu0 %v2036_v16  ;;  %563 = vmatprep.subr.mxu1 %v2107_v28 }
 0x12a   :  { %493 = vmatpush1.msra.mxu0 %v2048_v18  ;;  %564 = vmatpush1.msra.mxu1 %v2119_v30 }
 0x12b   :  { %494 = vmatprep.subr.mxu0 %v2065_v21  ;;  %565 = vmatprep.subr.mxu1 %v2131_v32 }
 0x12c   :  { %495 = vmatpush1.msra.mxu0 %v2077_v23  ;;  %566 = vmatpush1.msra.mxu1 %v2143_v34 }
 0x12d   :  { %496 = vmatprep.subr.mxu0 %v2089_v25  ;;  %567 = vmatprep.subr.mxu1 %v2155_v36 }
 0x12e   :  { %497 = vmatpush1.msra.mxu0 %v2101_v27  ;;  %568 = vmatpush1.msra.mxu1 %v2167_v38 }
 0x12f   :  { %498 = vmatprep.subr.mxu0 %v2113_v29  ;;  %569 = vmatprep.subr.mxu1 %v2179_v40 }
 0x130   :  { %499 = vmatpush1.msra.mxu0 %v2125_v31  ;;  %570 = vmatpush1.msra.mxu1 %v2191_v42 }
 0x131   :  { %500 = vmatprep.subr.mxu0 %v2137_v33  ;;  %571 = vmatprep.subr.mxu1 %v2203_v44 }
 0x132   :  { %501 = vmatpush1.msra.mxu0 %v2149_v35  ;;  %572 = vmatpush1.msra.mxu1 %v2215_v46 }
 0x133   :  { %502 = vmatprep.subr.mxu0 %v2161_v37  ;;  %573 = vmatprep.subr.mxu1 %v2227_v48 }
 0x134   :  { %503 = vmatpush1.msra.mxu0 %v2173_v39  ;;  %574 = vmatpush1.msra.mxu1 %v2239_v50 }
 0x135   :  { %504 = vmatprep.subr.mxu0 %v2185_v41  ;;  %575 = vmatprep.subr.mxu1 %v2251_v52 }
 0x136   :  { %505 = vmatpush1.msra.mxu0 %v2197_v43  ;;  %576 = vmatpush1.msra.mxu1 %v2268_v55 }
 0x137   :  { %506 = vmatprep.subr.mxu0 %v3412_v59  ;;  %577 = vmatprep.subr.mxu1 %v3413_v53 }
 0x138   :  { %507 = vmatpush1.msra.mxu0 %v3414_v58  ;;  %578 = vmatpush1.msra.mxu1 %v3415_v61 }
 0x139   :  { %508 = vmatprep.subr.mxu0 %v3416_v60  ;;  %579 = vmatprep.subr.mxu1 %v3417_v0  ;;  %v3427_v60 = vmov 0.0   ;;  %v3428_v0 = vld [vmem:[#allocation25_spill] sm:$0xff] }
 0x13a   :  { %509 = vmatpush1.msra.mxu0 %v3418_v54  ;;  %580 = vmatpush1.msra.mxu1 %v3419_v49  ;;  %v3429_v49 = vld [vmem:[#allocation5_spill] sm:$0xff] }
 0x13b   :  { %510 = vmatprep.subr.mxu0 %v3420_v57  ;;  %581 = vmatprep.subr.mxu1 %v3421_v7  ;;  %v3430_v57 = vld [vmem:[#allocation6_spill] sm:$0xff] }
 0x13c   :  { %511 = vmatpush1.msra.mxu0 %v3422_v4  ;;  %582 = vmatpush1.msra.mxu1 %v3423_v56 }
 0x13d   :  { %512 = vmatprep.subr.mxu0 %v3424_v10  ;;  %583 = vmatprep.subr.mxu1 %v3425_v45  ;;  %v1665_v10 = vld [vmem:[%s3288_s2 + $0x10] sm:$0xff] }
 0x13e   :  { %513 = vmatpush1.msra.mxu0 %v3426_v62  ;;  %546 = vmatprep.mubr.f32.mxu0 %v3427_v60 }
 0x13f   :  { %584 = vmatpush1.msra.mxu1 %v3428_v0  ;;  %617 = vmatprep.mubr.f32.mxu1 %v3427_v60 }
 0x140   :  { %677 = vmatprep.subr.mxu0 %v3429_v49  ;;  %748 = vmatprep.subr.mxu1 %v3430_v57  ;;  %v1666_v49 = vld [vmem:[%s3288_s2 + $0x18] sm:$0xff] }
 0x1df   :  { %v353_v7 = vpop.f32.mrf.mxu0  ;;  %v424_v4 = vpop.f32.mrf.mxu1 }
 0x1e1   :  { %v355_v56 = vpop.f32.mrf.mxu0  ;;  %v426_v62 = vpop.f32.mrf.mxu1 }
 0x1e2   :  { %v433_v45 = vcombine.low %v353_v7, %v355_v56  ;;  %v434_v53 = vcombine.low %v424_v4, %v426_v62  ;;  %v3434_v56 = vld [vmem:[#allocation8_spill] sm:$0xff] }
 0x1e4   :  { %v437_v54 = vadd.f32 %v1665_v10, %v433_v45  ;;  %v438_v57 = vadd.f32 %v1666_v49, %v434_v53 }
 0x1e6   :  { %v1669_v61 = vmul.f32 -1.442695, %v437_v54  ;;  %v446_v58 = vrot.slane %v437_v54, 4  ;;  %v456_v60 = vrot.slane %v438_v57, 4 }
 0x1e8   :  { %1723 = vpow2.f32 %v1669_v61  ;;  %v1670_v0 = vmul.f32 -1.442695, %v446_v58  ;;  %v1671_v59 = vmul.f32 -1.442695, %v456_v60 }
 0x1ea   :  { %1725 = vpow2.f32 %v1670_v0  ;;  %v473_v0 = vpop.permute.xlu0 %472 }
 0x1eb   :  { %1727 = vpow2.f32 %v1671_v59  ;;  %vm474_vm9 = vcmp.eq.s32.totalorder %v473_v0, 1  ;;  %v3443_v0 = vld [vmem:[#allocation22_spill] sm:$0xff] }
 0x1f5   :  { %v1724_v55 = vpop.eup %1723 }
 0x1f6   :  { %v442_v43 = vadd.f32 1.0, %v1724_v55 }
 0x1f7   :  { %v1726_v52 = vpop.eup %1725 }
 0x1f8   :  { %1729 = vrcp.f32 %v442_v43  ;;  %v451_v45 = vadd.f32 1.0, %v1726_v52  ;;  %v1728_v10 = vpop.eup %1727 }
 0x1f9   :  { %1731 = vtanh.f32 %v438_v57  ;;  %v461_v54 = vadd.f32 1.0, %v1728_v10  ;;  %v3436_v10 = vld [vmem:[#allocation9_spill] sm:$0xff] }
 0x1fa   :  { %1733 = vrcp.f32 %v451_v45  ;;  %v3435_v45 = vld [vmem:[#allocation16_spill] sm:$0xff] }
 0x1fb   :  { %1735 = vrcp.f32 %v461_v54  ;;  %v3440_v54 = vld [vmem:[#allocation11_spill] sm:$0xff] }
 0x205   :  { %v1730_v62 = vpop.eup %1729 }
 0x206   :  { %v1732_v61 = vpop.eup %1731 }
 0x207   :  { %v1734_v58 = vpop.eup %1733  ;;  %v465_v4 = vmul.f32 %v1732_v61, %v1730_v62  ;;  %v3437_v62 = vld [vmem:[#allocation18_spill] sm:$0xff] }
 0x208   :  { %v464_v7 = vmul.f32 %v1734_v58, %v2440_v47  ;;  %v1736_v43 = vpop.eup %1735  ;;  %v3438_v61 = vld [vmem:[#allocation10_spill] sm:$0xff]  ;;  %v3439_v58 = vld [vmem:[#allocation20_spill] sm:$0xff] }
 0x20a   :  { %v466_v53 = vadd.f32 %v465_v4, %v464_v7  ;;  %v3441_v7 = vld [vmem:[#allocation21_spill] sm:$0xff] }
 0x20b   :  { %v3442_v4 = vld [vmem:[#allocation13_spill] sm:$0xff] }
 0x20c   :  { %1737 = vtanh.f32 %v466_v53  ;;  %v2528_v55 = vsel %vm474_vm9, %v466_v53, %v2440_v47  ;;  %v3431_v47 = vld [vmem:[#allocation12_spill] sm:$0xff]  ;;  %v3444_v53 = vld [vmem:[#allocation15_spill] sm:$0xff] }
 0x219   :  { %v1738_v52 = vpop.eup %1737 }
 0x21a   :  { %v468_v59 = vmul.f32 %v1738_v52, %v1736_v43  ;;  %v3445_v43 = vld [vmem:[#allocation23_spill] sm:$0xff]  ;;  %v3446_v52 = vld [vmem:[#allocation17_spill] sm:$0xff] }
 0x21c   :  { %v2531_v60 = vsel %vm474_vm9, %v468_v59, %v2449_v51  ;;  %v477_v49 = vmax.f32 %v2454_v63, %v468_v59  ;;  %v3432_v51 = vld [vmem:[#allocation7_spill] sm:$0xff]  ;;  %v3447_v59 = vld [vmem:[#allocation24_spill] sm:$0xff] }
 0x21d   :  { %547 = vmatmul.mubr.f32.vlgmr.msra.gmra.mxu0 %v2531_v60  ;;  %618 = vmatmul.mubr.f32.vlgmr.msra.gmra.mxu1 %v2531_v60 }
 0x21e   :  { %678 = vmatpush1.msra.mxu0 %v1957_v1  ;;  %749 = vmatpush1.msra.mxu1 %v2013_v12  ;;  %v2539_v57 = vsel %vm474_vm9, %v477_v49, %v2454_v63  ;;  %v3433_v63 = vld [vmem:[#allocation14_spill] sm:$0xff]  ;;  %v3448_v49 = vld [vmem:[#allocation19_spill] sm:$0xff] }
 0x21f   :  { %679 = vmatprep.subr.mxu0 %v1962_v2  ;;  %750 = vmatprep.subr.mxu1 %v2025_v14 }
 0x220   :  { %680 = vmatpush1.msra.mxu0 %v1968_v3  ;;  %751 = vmatpush1.msra.mxu1 %v2030_v15 }
 0x221   :  { %681 = vmatprep.subr.mxu0 %v1975_v5  ;;  %752 = vmatprep.subr.mxu1 %v2042_v17 }
 0x222   :  { %682 = vmatpush1.msra.mxu0 %v1982_v6  ;;  %753 = vmatpush1.msra.mxu1 %v2054_v19 }
 0x223   :  { %683 = vmatprep.subr.mxu0 %v1989_v8  ;;  %754 = vmatprep.subr.mxu1 %v2059_v20 }
 0x224   :  { %684 = vmatpush1.msra.mxu0 %v1996_v9  ;;  %755 = vmatpush1.msra.mxu1 %v2071_v22 }
 0x225   :  { %685 = vmatprep.subr.mxu0 %v2007_v11  ;;  %756 = vmatprep.subr.mxu1 %v2083_v24 }
 0x226   :  { %686 = vmatpush1.msra.mxu0 %v2019_v13  ;;  %757 = vmatpush1.msra.mxu1 %v2095_v26 }
 0x227   :  { %687 = vmatprep.subr.mxu0 %v2036_v16  ;;  %758 = vmatprep.subr.mxu1 %v2107_v28 }
 0x228   :  { %688 = vmatpush1.msra.mxu0 %v2048_v18  ;;  %759 = vmatpush1.msra.mxu1 %v2119_v30 }
 0x229   :  { %689 = vmatprep.subr.mxu0 %v2065_v21  ;;  %760 = vmatprep.subr.mxu1 %v2131_v32 }
 0x22a   :  { %690 = vmatpush1.msra.mxu0 %v2077_v23  ;;  %761 = vmatpush1.msra.mxu1 %v2143_v34 }
 0x22b   :  { %691 = vmatprep.subr.mxu0 %v2089_v25  ;;  %762 = vmatprep.subr.mxu1 %v2155_v36 }
 0x22c   :  { %692 = vmatpush1.msra.mxu0 %v2101_v27  ;;  %763 = vmatpush1.msra.mxu1 %v2167_v38 }
 0x22d   :  { %693 = vmatprep.subr.mxu0 %v2113_v29  ;;  %764 = vmatprep.subr.mxu1 %v2179_v40 }
 0x22e   :  { %694 = vmatpush1.msra.mxu0 %v2125_v31  ;;  %765 = vmatpush1.msra.mxu1 %v2191_v42 }
 0x22f   :  { %695 = vmatprep.subr.mxu0 %v2137_v33  ;;  %766 = vmatprep.subr.mxu1 %v2203_v44 }
 0x230   :  { %696 = vmatpush1.msra.mxu0 %v2149_v35  ;;  %767 = vmatpush1.msra.mxu1 %v2215_v46 }
 0x231   :  { %697 = vmatprep.subr.mxu0 %v2161_v37  ;;  %768 = vmatprep.subr.mxu1 %v2227_v48 }
 0x232   :  { %698 = vmatpush1.msra.mxu0 %v2173_v39  ;;  %769 = vmatpush1.msra.mxu1 %v2239_v50 }
 0x233   :  { %699 = vmatprep.subr.mxu0 %v2185_v41  ;;  %770 = vmatprep.subr.mxu1 %v3431_v47 }
 0x234   :  { %700 = vmatpush1.msra.mxu0 %v3432_v51  ;;  %771 = vmatpush1.msra.mxu1 %v3433_v63 }
 0x235   :  { %701 = vmatprep.subr.mxu0 %v3434_v56  ;;  %772 = vmatprep.subr.mxu1 %v3435_v45 }
 0x236   :  { %702 = vmatpush1.msra.mxu0 %v3436_v10  ;;  %773 = vmatpush1.msra.mxu1 %v3437_v62 }
 0x237   :  { %703 = vmatprep.subr.mxu0 %v3438_v61  ;;  %774 = vmatprep.subr.mxu1 %v3439_v58  ;;  %v3449_v61 = vmov 0.0   ;;  %v3450_v58 = vld [vmem:[#allocation25_spill] sm:$0xff] }
 0x238   :  { %704 = vmatpush1.msra.mxu0 %v3440_v54  ;;  %775 = vmatpush1.msra.mxu1 %v3441_v7  ;;  %v3451_v7 = vld [vmem:[#allocation5_spill] sm:$0xff] }
 0x239   :  { %705 = vmatprep.subr.mxu0 %v3442_v4  ;;  %776 = vmatprep.subr.mxu1 %v3443_v0  ;;  %v3452_v4 = vld [vmem:[#allocation6_spill] sm:$0xff] }
 0x23a   :  { %706 = vmatpush1.msra.mxu0 %v3444_v53  ;;  %777 = vmatpush1.msra.mxu1 %v3445_v43 }
 0x23b   :  { %707 = vmatprep.subr.mxu0 %v3446_v52  ;;  %778 = vmatprep.subr.mxu1 %v3447_v59  ;;  %v1672_v52 = vld [vmem:[%s3288_s2 + $0x20] sm:$0xff] }
 0x23c   :  { %708 = vmatpush1.msra.mxu0 %v3448_v49  ;;  %741 = vmatprep.mubr.f32.mxu0 %v3449_v61 }
 0x23d   :  { %779 = vmatpush1.msra.mxu1 %v3450_v58  ;;  %812 = vmatprep.mubr.f32.mxu1 %v3449_v61 }
 0x23e   :  { %872 = vmatprep.subr.mxu0 %v3451_v7  ;;  %943 = vmatprep.subr.mxu1 %v3452_v4  ;;  %v1673_v7 = vld [vmem:[%s3288_s2 + $0x28] sm:$0xff] }
 0x2dd   :  { %v548_v0 = vpop.f32.mrf.mxu0  ;;  %v619_v53 = vpop.f32.mrf.mxu1 }
 0x2df   :  { %v550_v43 = vpop.f32.mrf.mxu0  ;;  %v621_v49 = vpop.f32.mrf.mxu1 }
 0x2e0   :  { %v628_v59 = vcombine.low %v548_v0, %v550_v43  ;;  %v629_v45 = vcombine.low %v619_v53, %v621_v49 }
 0x2e2   :  { %v632_v54 = vadd.f32 %v1672_v52, %v628_v59  ;;  %v633_v4 = vadd.f32 %v1673_v7, %v629_v45 }
 0x2e4   :  { %v1674_v62 = vmul.f32 -1.442695, %v632_v54  ;;  %v641_v10 = vrot.slane %v632_v54, 4  ;;  %v651_v61 = vrot.slane %v633_v4, 4 }
 0x2e6   :  { %1739 = vpow2.f32 %v1674_v62  ;;  %v1675_v58 = vmul.f32 -1.442695, %v641_v10  ;;  %v1676_v56 = vmul.f32 -1.442695, %v651_v61 }
 0x2e8   :  { %1741 = vpow2.f32 %v1675_v58  ;;  %v3453_v58 = vld [vmem:[#allocation26_spill] sm:$0xff] }
 0x2e9   :  { %1743 = vpow2.f32 %v1676_v56  ;;  %vm669_vm10 = vcmp.eq.s32.totalorder %v3453_v58, 1 }
 0x2f3   :  { %v1740_v63 = vpop.eup %1739 }
 0x2f4   :  { %v637_v51 = vadd.f32 1.0, %v1740_v63 }
 0x2f5   :  { %v1742_v47 = vpop.eup %1741 }
 0x2f6   :  { %1745 = vrcp.f32 %v637_v51  ;;  %v646_v0 = vadd.f32 1.0, %v1742_v47  ;;  %v1744_v54 = vpop.eup %1743 }
 0x2f7   :  { %1747 = vtanh.f32 %v633_v4  ;;  %v656_v43 = vadd.f32 1.0, %v1744_v54 }
 0x2f8   :  { %1749 = vrcp.f32 %v646_v0 }
 0x2f9   :  { %1751 = vrcp.f32 %v656_v43 }
 0x303   :  { %v1746_v53 = vpop.eup %1745 }
 0x304   :  { %v1748_v62 = vpop.eup %1747 }
 0x305   :  { %v1750_v10 = vpop.eup %1749  ;;  %v660_v59 = vmul.f32 %v1748_v62, %v1746_v53  ;;  %v3476_v53 = vld [vmem:[#allocation27_spill] sm:$0xff] }
 0x306   :  { %v659_v52 = vmul.f32 %v1750_v10, %v2528_v55  ;;  %v1752_v51 = vpop.eup %1751  ;;  %vm864_vm11 = vcmp.eq.s32.totalorder %v3476_v53, 1  ;;  %v3042_v53 = vld [vmem:[%s3289_s3 + $0x50] sm:$0xff] }
 0x308   :  { %v661_v45 = vadd.f32 %v660_v59, %v659_v52 }
 0x30a   :  { %1753 = vtanh.f32 %v661_v45  ;;  %v2614_v63 = vsel %vm669_vm10, %v661_v45, %v2528_v55  ;;  %v2721_v45 = vld [vmem:[%s3289_s3 + $0x1e0] sm:$0xff] }
 0x317   :  { %v1754_v47 = vpop.eup %1753 }
 0x318   :  { %v663_v56 = vmul.f32 %v1754_v47, %v1752_v51  ;;  %v2736_v47 = vld [vmem:[%s3289_s3 + $0x1c8] sm:$0xff] }
 0x31a   :  { %v2617_v61 = vsel %vm669_vm10, %v663_v56, %v2531_v60  ;;  %v672_v49 = vmax.f32 %v2539_v57, %v663_v56  ;;  %v2742_v56 = vld [vmem:[%s3289_s3 + $0x1d8] sm:$0xff] }
 0x31b   :  { %742 = vmatmul.mubr.f32.vlgmr.msra.gmra.mxu0 %v2617_v61  ;;  %813 = vmatmul.mubr.f32.vlgmr.msra.gmra.mxu1 %v2617_v61 }
 0x31c   :  { %873 = vmatpush1.msra.mxu0 %v1957_v1  ;;  %944 = vmatpush1.msra.mxu1 %v2013_v12  ;;  %v2625_v7 = vsel %vm669_vm10, %v672_v49, %v2539_v57  ;;  %v3454_v1 = vld [vmem:[#allocation12_spill] sm:$0xff]  ;;  %v2754_v49 = vld [vmem:[%s3289_s3 + $0x1d0] sm:$0xff] }
 0x31d   :  { %874 = vmatprep.subr.mxu0 %v1962_v2  ;;  %945 = vmatprep.subr.mxu1 %v2025_v14  ;;  %v3455_v2 = vld [vmem:[#allocation7_spill] sm:$0xff]  ;;  %v3462_v12 = vld [vmem:[#allocation20_spill] sm:$0xff]  ;;  %v3464_v14 = vld [vmem:[#allocation21_spill] sm:$0xff] }
 0x31e   :  { %875 = vmatpush1.msra.mxu0 %v1968_v3  ;;  %946 = vmatpush1.msra.mxu1 %v2030_v15  ;;  %v3456_v3 = vld [vmem:[#allocation14_spill] sm:$0xff]  ;;  %v3465_v15 = vld [vmem:[#allocation13_spill] sm:$0xff] }
 0x31f   :  { %876 = vmatprep.subr.mxu0 %v1975_v5  ;;  %947 = vmatprep.subr.mxu1 %v2042_v17  ;;  %v3457_v5 = vld [vmem:[#allocation8_spill] sm:$0xff]  ;;  %v3467_v17 = vld [vmem:[#allocation15_spill] sm:$0xff] }
 0x320   :  { %877 = vmatpush1.msra.mxu0 %v1982_v6  ;;  %948 = vmatpush1.msra.mxu1 %v2054_v19  ;;  %v3458_v6 = vld [vmem:[#allocation16_spill] sm:$0xff]  ;;  %v3469_v19 = vld [vmem:[#allocation17_spill] sm:$0xff] }
 0x321   :  { %878 = vmatprep.subr.mxu0 %v1989_v8  ;;  %949 = vmatprep.subr.mxu1 %v2059_v20  ;;  %v3459_v8 = vld [vmem:[#allocation9_spill] sm:$0xff]  ;;  %v3470_v20 = vld [vmem:[#allocation24_spill] sm:$0xff] }
 0x322   :  { %879 = vmatpush1.msra.mxu0 %v1996_v9  ;;  %950 = vmatpush1.msra.mxu1 %v2071_v22  ;;  %v3460_v9 = vld [vmem:[#allocation18_spill] sm:$0xff]  ;;  %v3472_v22 = vmov 0.0  }
 0x323   :  { %880 = vmatprep.subr.mxu0 %v2007_v11  ;;  %951 = vmatprep.subr.mxu1 %v2083_v24  ;;  %v3461_v11 = vld [vmem:[#allocation10_spill] sm:$0xff] }
 0x324   :  { %881 = vmatpush1.msra.mxu0 %v2019_v13  ;;  %952 = vmatpush1.msra.mxu1 %v2095_v26  ;;  %v3463_v13 = vld [vmem:[#allocation11_spill] sm:$0xff]  ;;  %v2692_v24 = vld [vmem:[%s3289_s3 + $0x1e8] sm:$0xff] }
 0x325   :  { %882 = vmatprep.subr.mxu0 %v2036_v16  ;;  %953 = vmatprep.subr.mxu1 %v2107_v28  ;;  %v3466_v16 = vld [vmem:[#allocation22_spill] sm:$0xff]  ;;  %3474 = vst [vmem:[#allocation5_spill] sm:$0xff] %v2692_v24  ;;  %3487 = vst [vmem:[#allocation11_spill] sm:$0xff] %v3042_v53 }
 0x326   :  { %883 = vmatpush1.msra.mxu0 %v2048_v18  ;;  %954 = vmatpush1.msra.mxu1 %v2119_v30  ;;  %v3468_v18 = vld [vmem:[#allocation23_spill] sm:$0xff] }
 0x327   :  { %884 = vmatprep.subr.mxu0 %v2065_v21  ;;  %955 = vmatprep.subr.mxu1 %v2131_v32  ;;  %v3471_v21 = vld [vmem:[#allocation19_spill] sm:$0xff] }
 0x328   :  { %885 = vmatpush1.msra.mxu0 %v2077_v23  ;;  %956 = vmatpush1.msra.mxu1 %v2143_v34  ;;  %v3473_v23 = vld [vmem:[#allocation25_spill] sm:$0xff]  ;;  %v1677_v28 = vld [vmem:[%s3288_s2 + $0x30] sm:$0xff] }
 0x329   :  { %886 = vmatprep.subr.mxu0 %v2089_v25  ;;  %957 = vmatprep.subr.mxu1 %v2155_v36  ;;  %v2698_v25 = vld [vmem:[%s3289_s3 + $0x1f8] sm:$0xff] }
 0x32a   :  { %887 = vmatpush1.msra.mxu0 %v2101_v27  ;;  %958 = vmatpush1.msra.mxu1 %v2167_v38  ;;  %3475 = vst [vmem:[#allocation6_spill] sm:$0xff] %v2698_v25 }
 0x32b   :  { %888 = vmatprep.subr.mxu0 %v2113_v29  ;;  %959 = vmatprep.subr.mxu1 %v2179_v40 }
 0x32c   :  { %889 = vmatpush1.msra.mxu0 %v2125_v31  ;;  %960 = vmatpush1.msra.mxu1 %v2191_v42 }
 0x32d   :  { %890 = vmatprep.subr.mxu0 %v2137_v33  ;;  %961 = vmatprep.subr.mxu1 %v2203_v44 }
 0x32e   :  { %891 = vmatpush1.msra.mxu0 %v2149_v35  ;;  %962 = vmatpush1.msra.mxu1 %v2215_v46 }
 0x32f   :  { %892 = vmatprep.subr.mxu0 %v2161_v37  ;;  %963 = vmatprep.subr.mxu1 %v2227_v48  ;;  %v1678_v37 = vld [vmem:[%s3288_s2 + $0x38] sm:$0xff] }
 0x330   :  { %893 = vmatpush1.msra.mxu0 %v2173_v39  ;;  %964 = vmatpush1.msra.mxu1 %v2239_v50 }
 0x331   :  { %894 = vmatprep.subr.mxu0 %v2185_v41  ;;  %965 = vmatprep.subr.mxu1 %v3454_v1  ;;  %v2766_v1 = vld [vmem:[%s3289_s3 + $0x1b8] sm:$0xff] }
 0x332   :  { %895 = vmatpush1.msra.mxu0 %v3455_v2  ;;  %966 = vmatpush1.msra.mxu1 %v3456_v3  ;;  %v2772_v2 = vld [vmem:[%s3289_s3 + $0x1a0] sm:$0xff]  ;;  %v2778_v3 = vld [vmem:[%s3289_s3 + $0x1b0] sm:$0xff] }
 0x333   :  { %896 = vmatprep.subr.mxu0 %v3457_v5  ;;  %967 = vmatprep.subr.mxu1 %v3458_v6  ;;  %v2784_v5 = vld [vmem:[%s3289_s3 + $0x188] sm:$0xff]  ;;  %v2790_v6 = vld [vmem:[%s3289_s3 + $0x198] sm:$0xff] }
 0x334   :  { %897 = vmatpush1.msra.mxu0 %v3459_v8  ;;  %968 = vmatpush1.msra.mxu1 %v3460_v9  ;;  %v2796_v8 = vld [vmem:[%s3289_s3 + $0x180] sm:$0xff]  ;;  %v2802_v9 = vld [vmem:[%s3289_s3 + $0x190] sm:$0xff] }
 0x335   :  { %898 = vmatprep.subr.mxu0 %v3461_v11  ;;  %969 = vmatprep.subr.mxu1 %v3462_v12  ;;  %v2808_v11 = vld [vmem:[%s3289_s3 + $0x168] sm:$0xff]  ;;  %v2814_v12 = vld [vmem:[%s3289_s3 + $0x178] sm:$0xff] }
 0x336   :  { %899 = vmatpush1.msra.mxu0 %v3463_v13  ;;  %970 = vmatpush1.msra.mxu1 %v3464_v14  ;;  %v2820_v13 = vld [vmem:[%s3289_s3 + $0x160] sm:$0xff]  ;;  %v2826_v14 = vld [vmem:[%s3289_s3 + $0x170] sm:$0xff] }
 0x337   :  { %900 = vmatprep.subr.mxu0 %v3465_v15  ;;  %971 = vmatprep.subr.mxu1 %v3466_v16  ;;  %v2832_v15 = vld [vmem:[%s3289_s3 + $0x148] sm:$0xff]  ;;  %v2838_v16 = vld [vmem:[%s3289_s3 + $0x158] sm:$0xff] }
 0x338   :  { %901 = vmatpush1.msra.mxu0 %v3467_v17  ;;  %972 = vmatpush1.msra.mxu1 %v3468_v18  ;;  %v2844_v17 = vld [vmem:[%s3289_s3 + $0x140] sm:$0xff]  ;;  %v2850_v18 = vld [vmem:[%s3289_s3 + $0x150] sm:$0xff] }
 0x339   :  { %902 = vmatprep.subr.mxu0 %v3469_v19  ;;  %973 = vmatprep.subr.mxu1 %v3470_v20  ;;  %v2856_v19 = vld [vmem:[%s3289_s3 + $0x128] sm:$0xff]  ;;  %v2862_v20 = vld [vmem:[%s3289_s3 + $0x138] sm:$0xff] }
 0x33a   :  { %903 = vmatpush1.msra.mxu0 %v3471_v21  ;;  %936 = vmatprep.mubr.f32.mxu0 %v3472_v22  ;;  %v2868_v21 = vld [vmem:[%s3289_s3 + $0x120] sm:$0xff] }
 0x33b   :  { %974 = vmatpush1.msra.mxu1 %v3473_v23  ;;  %1007 = vmatprep.mubr.f32.mxu1 %v3472_v22  ;;  %v2874_v23 = vld [vmem:[%s3289_s3 + $0x130] sm:$0xff] }
 0x33c   :  { %1067 = vmatprep.subr.mxu0 %v2692_v24  ;;  %1138 = vmatprep.subr.mxu1 %v2698_v25 }
 0x3db   :  { %v743_v26 = vpop.f32.mrf.mxu0  ;;  %v814_v27 = vpop.f32.mrf.mxu1 }
 0x3dd   :  { %v745_v29 = vpop.f32.mrf.mxu0  ;;  %v816_v32 = vpop.f32.mrf.mxu1 }
 0x3de   :  { %v823_v30 = vcombine.low %v743_v26, %v745_v29  ;;  %v824_v35 = vcombine.low %v814_v27, %v816_v32  ;;  %v2880_v26 = vld [vmem:[%s3289_s3 + $0x108] sm:$0xff]  ;;  %v2886_v27 = vld [vmem:[%s3289_s3 + $0x118] sm:$0xff]  ;;  %v2898_v29 = vld [vmem:[%s3289_s3 + $0x110] sm:$0xff] }
 0x3df   :  { %v2916_v32 = vld [vmem:[%s3289_s3 + $0xe0] sm:$0xff] }
 0x3e0   :  { %v827_v31 = vadd.f32 %v1677_v28, %v823_v30  ;;  %v828_v38 = vadd.f32 %v1678_v37, %v824_v35  ;;  %v2892_v28 = vld [vmem:[%s3289_s3 + $0x100] sm:$0xff]  ;;  %v2904_v30 = vld [vmem:[%s3289_s3 + $0xe8] sm:$0xff]  ;;  %v2934_v35 = vld [vmem:[%s3289_s3 + $0xd8] sm:$0xff] }
 0x3e1   :  { %v2946_v37 = vld [vmem:[%s3289_s3 + $0xd0] sm:$0xff] }
 0x3e2   :  { %v1679_v33 = vmul.f32 -1.442695, %v827_v31  ;;  %v836_v34 = vrot.slane %v827_v31, 4  ;;  %v846_v39 = vrot.slane %v828_v38, 4  ;;  %v2910_v31 = vld [vmem:[%s3289_s3 + $0xf8] sm:$0xff] }
 0x3e4   :  { %1755 = vpow2.f32 %v1679_v33  ;;  %v1680_v36 = vmul.f32 -1.442695, %v836_v34  ;;  %v1681_v40 = vmul.f32 -1.442695, %v846_v39  ;;  %v2922_v33 = vld [vmem:[%s3289_s3 + $0xf0] sm:$0xff]  ;;  %v2928_v34 = vld [vmem:[%s3289_s3 + $0xc8] sm:$0xff] }
 0x3e5   :  { %v2958_v39 = vld [vmem:[%s3289_s3 + $0xb8] sm:$0xff] }
 0x3e6   :  { %1757 = vpow2.f32 %v1680_v36  ;;  %v2940_v36 = vld [vmem:[%s3289_s3 + $0xc0] sm:$0xff] }
 0x3e7   :  { %1759 = vpow2.f32 %v1681_v40  ;;  %v2964_v40 = vld [vmem:[%s3289_s3 + $0xa0] sm:$0xff] }
 0x3f1   :  { %v1756_v41 = vpop.eup %1755 }
 0x3f2   :  { %v832_v42 = vadd.f32 1.0, %v1756_v41  ;;  %v2970_v41 = vld [vmem:[%s3289_s3 + $0xb0] sm:$0xff] }
 0x3f3   :  { %v1758_v44 = vpop.eup %1757 }
 0x3f4   :  { %1761 = vrcp.f32 %v832_v42  ;;  %v841_v46 = vadd.f32 1.0, %v1758_v44  ;;  %v1760_v48 = vpop.eup %1759  ;;  %v2976_v42 = vld [vmem:[%s3289_s3 + $0x88] sm:$0xff]  ;;  %v2982_v44 = vld [vmem:[%s3289_s3 + $0x98] sm:$0xff] }
 0x3f5   :  { %1763 = vtanh.f32 %v828_v38  ;;  %v851_v57 = vadd.f32 1.0, %v1760_v48  ;;  %v2952_v38 = vld [vmem:[%s3289_s3 + $0xa8] sm:$0xff]  ;;  %3477 = vst [vmem:[#allocation26_spill] sm:$0xff] %v2982_v44  ;;  %v2994_v48 = vld [vmem:[%s3289_s3 + $0x90] sm:$0xff] }
 0x3f6   :  { %1765 = vrcp.f32 %v841_v46  ;;  %v2988_v46 = vld [vmem:[%s3289_s3 + $0x80] sm:$0xff]  ;;  %3479 = vst [vmem:[#allocation7_spill] sm:$0xff] %v2994_v48 }
 0x3f7   :  { %1767 = vrcp.f32 %v851_v57  ;;  %3478 = vst [vmem:[#allocation12_spill] sm:$0xff] %v2988_v46  ;;  %v3018_v57 = vld [vmem:[%s3289_s3 + $0x70] sm:$0xff] }
 0x3f8   :  { %3483 = vst [vmem:[#allocation9_spill] sm:$0xff] %v3018_v57 }
 0x401   :  { %v1762_v50 = vpop.eup %1761 }
 0x402   :  { %v1764_v55 = vpop.eup %1763 }
 0x403   :  { %v1766_v60 = vpop.eup %1765  ;;  %v855_v0 = vmul.f32 %v1764_v55, %v1762_v50  ;;  %v3000_v50 = vld [vmem:[%s3289_s3 + $0x68] sm:$0xff]  ;;  %v3006_v55 = vld [vmem:[%s3289_s3 + $0x78] sm:$0xff] }
 0x404   :  { %v854_v4 = vmul.f32 %v1766_v60, %v2614_v63  ;;  %v1768_v10 = vpop.eup %1767  ;;  %3480 = vst [vmem:[#allocation14_spill] sm:$0xff] %v3000_v50  ;;  %3481 = vst [vmem:[#allocation8_spill] sm:$0xff] %v3006_v55  ;;  %v3012_v60 = vld [vmem:[%s3289_s3 + $0x60] sm:$0xff] }
 0x405   :  { %3482 = vst [vmem:[#allocation16_spill] sm:$0xff] %v3012_v60 }
 0x406   :  { %v856_v54 = vadd.f32 %v855_v0, %v854_v4  ;;  %v3024_v4 = vld [vmem:[%s3289_s3 + $0x48] sm:$0xff]  ;;  %v3030_v0 = vld [vmem:[%s3289_s3 + $0x58] sm:$0xff] }
 0x407   :  { %3484 = vst [vmem:[#allocation18_spill] sm:$0xff] %v3024_v4  ;;  %3485 = vst [vmem:[#allocation10_spill] sm:$0xff] %v3030_v0 }
 0x408   :  { %1769 = vtanh.f32 %v856_v54  ;;  %v2710_v62 = vsel %vm864_vm11, %v856_v54, %v2614_v63  ;;  %v2727_v63 = vld [vmem:[%s3289_s3 + $0x1f0] sm:$0xff]  ;;  %v3036_v54 = vld [vmem:[%s3289_s3 + $0x40] sm:$0xff] }
 0x409   :  { %3486 = vst [vmem:[#allocation20_spill] sm:$0xff] %v3036_v54 }
 0x415   :  { %v1770_v43 = vpop.eup %1769 }
 0x416   :  { %v858_v52 = vmul.f32 %v1770_v43, %v1768_v10  ;;  %v3048_v10 = vld [vmem:[%s3289_s3 + $0x28] sm:$0xff]  ;;  %v3054_v43 = vld [vmem:[%s3289_s3 + $0x38] sm:$0xff] }
 0x417   :  { %3488 = vst [vmem:[#allocation21_spill] sm:$0xff] %v3048_v10  ;;  %3489 = vst [vmem:[#allocation13_spill] sm:$0xff] %v3054_v43 }
 0x418   :  { %v2713_v59 = vsel %vm864_vm11, %v858_v52, %v2617_v61  ;;  %v867_v58 = vmax.f32 %v2625_v7, %v858_v52  ;;  %v2748_v61 = vld [vmem:[%s3289_s3 + $0x1c0] sm:$0xff] }
 0x419   :  { %937 = vmatmul.mubr.f32.vlgmr.msra.gmra.mxu0 %v2713_v59  ;;  %1008 = vmatmul.mubr.f32.vlgmr.msra.gmra.mxu1 %v2713_v59  ;;  %v3060_v52 = vld [vmem:[%s3289_s3 + $0x20] sm:$0xff] }
 0x41a   :  { %1068 = vmatpush1.msra.mxu0 %v2721_v45  ;;  %1139 = vmatpush1.msra.mxu1 %v2727_v63  ;;  %v2731_v51 = vsel %vm864_vm11, %v867_v58, %v2625_v7  ;;  %v2760_v7 = vld [vmem:[%s3289_s3 + $0x1a8] sm:$0xff]  ;;  %3490 = vst [vmem:[#allocation22_spill] sm:$0xff] %v3060_v52  ;;  %v3066_v58 = vld [vmem:[%s3289_s3 + $0x30] sm:$0xff] }
 0x41b   :  { %1069 = vmatprep.subr.mxu0 %v2736_v47  ;;  %1140 = vmatprep.subr.mxu1 %v2742_v56  ;;  %3491 = vst [vmem:[#allocation15_spill] sm:$0xff] %v3066_v58 }
 0x41c   :  { %1070 = vmatpush1.msra.mxu0 %v2748_v61  ;;  %1141 = vmatpush1.msra.mxu1 %v2754_v49 }
 0x41d   :  { %1071 = vmatprep.subr.mxu0 %v2760_v7  ;;  %1142 = vmatprep.subr.mxu1 %v2766_v1 }
 0x41e   :  { %1072 = vmatpush1.msra.mxu0 %v2772_v2  ;;  %1143 = vmatpush1.msra.mxu1 %v2778_v3 }
 0x41f   :  { %1073 = vmatprep.subr.mxu0 %v2784_v5  ;;  %1144 = vmatprep.subr.mxu1 %v2790_v6 }
 0x420   :  { %1074 = vmatpush1.msra.mxu0 %v2796_v8  ;;  %1145 = vmatpush1.msra.mxu1 %v2802_v9 }
 0x421   :  { %1075 = vmatprep.subr.mxu0 %v2808_v11  ;;  %1146 = vmatprep.subr.mxu1 %v2814_v12 }
 0x422   :  { %1076 = vmatpush1.msra.mxu0 %v2820_v13  ;;  %1147 = vmatpush1.msra.mxu1 %v2826_v14 }
 0x423   :  { %1077 = vmatprep.subr.mxu0 %v2832_v15  ;;  %1148 = vmatprep.subr.mxu1 %v2838_v16 }
 0x424   :  { %1078 = vmatpush1.msra.mxu0 %v2844_v17  ;;  %1149 = vmatpush1.msra.mxu1 %v2850_v18 }
 0x425   :  { %1079 = vmatprep.subr.mxu0 %v2856_v19  ;;  %1150 = vmatprep.subr.mxu1 %v2862_v20 }
 0x426   :  { %1080 = vmatpush1.msra.mxu0 %v2868_v21  ;;  %1151 = vmatpush1.msra.mxu1 %v2874_v23 }
 0x427   :  { %1081 = vmatprep.subr.mxu0 %v2880_v26  ;;  %1152 = vmatprep.subr.mxu1 %v2886_v27 }
 0x428   :  { %1082 = vmatpush1.msra.mxu0 %v2892_v28  ;;  %1153 = vmatpush1.msra.mxu1 %v2898_v29 }
 0x429   :  { %1083 = vmatprep.subr.mxu0 %v2904_v30  ;;  %1154 = vmatprep.subr.mxu1 %v2910_v31 }
 0x42a   :  { %1084 = vmatpush1.msra.mxu0 %v2916_v32  ;;  %1155 = vmatpush1.msra.mxu1 %v2922_v33 }
 0x42b   :  { %1085 = vmatprep.subr.mxu0 %v2928_v34  ;;  %1156 = vmatprep.subr.mxu1 %v2934_v35 }
 0x42c   :  { %1086 = vmatpush1.msra.mxu0 %v2940_v36  ;;  %1157 = vmatpush1.msra.mxu1 %v2946_v37 }
 0x42d   :  { %1087 = vmatprep.subr.mxu0 %v2952_v38  ;;  %1158 = vmatprep.subr.mxu1 %v2958_v39 }
 0x42e   :  { %1088 = vmatpush1.msra.mxu0 %v2964_v40  ;;  %1159 = vmatpush1.msra.mxu1 %v2970_v41 }
 0x42f   :  { %1089 = vmatprep.subr.mxu0 %v2976_v42  ;;  %1160 = vmatprep.subr.mxu1 %v2982_v44 }
 0x430   :  { %1090 = vmatpush1.msra.mxu0 %v2988_v46  ;;  %1161 = vmatpush1.msra.mxu1 %v2994_v48 }
 0x431   :  { %1091 = vmatprep.subr.mxu0 %v3000_v50  ;;  %1162 = vmatprep.subr.mxu1 %v3006_v55 }
 0x432   :  { %1092 = vmatpush1.msra.mxu0 %v3012_v60  ;;  %1163 = vmatpush1.msra.mxu1 %v3018_v57 }
 0x433   :  { %1093 = vmatprep.subr.mxu0 %v3024_v4  ;;  %1164 = vmatprep.subr.mxu1 %v3030_v0 }
 0x434   :  { %1094 = vmatpush1.msra.mxu0 %v3036_v54  ;;  %1165 = vmatpush1.msra.mxu1 %v3042_v53 }
 0x435   :  { %1095 = vmatprep.subr.mxu0 %v3048_v10  ;;  %1166 = vmatprep.subr.mxu1 %v3054_v43  ;;  %v3072_v10 = vld [vmem:[%s3289_s3 + $0x8] sm:$0xff]  ;;  %v3078_v43 = vld [vmem:[%s3289_s3 + $0x18] sm:$0xff] }
 0x436   :  { %1096 = vmatpush1.msra.mxu0 %v3060_v52  ;;  %1167 = vmatpush1.msra.mxu1 %v3066_v58  ;;  %3492 = vst [vmem:[#allocation23_spill] sm:$0xff] %v3072_v10  ;;  %3493 = vst [vmem:[#allocation17_spill] sm:$0xff] %v3078_v43  ;;  %v3084_v52 = vld [vmem:[%s3289_s3] sm:$0xff] }
 0x437   :  { %1097 = vmatprep.subr.mxu0 %v3072_v10  ;;  %1168 = vmatprep.subr.mxu1 %v3078_v43  ;;  %3494 = vst [vmem:[#allocation24_spill] sm:$0xff] %v3084_v52  ;;  %v3091_v10 = vld [vmem:[%s3289_s3 + $0x10] sm:$0xff] }
 0x438   :  { %1098 = vmatpush1.msra.mxu0 %v3084_v52  ;;  %1131 = vmatprep.mubr.f32.mxu0 %v3472_v22  ;;  %3495 = vst [vmem:[#allocation19_spill] sm:$0xff] %v3091_v10  ;;  %v1682_v52 = vld [vmem:[%s3288_s2 + $0x40] sm:$0xff] }
 0x439   :  { %1169 = vmatpush1.msra.mxu1 %v3091_v10  ;;  %1202 = vmatprep.mubr.f32.mxu1 %v3472_v22 }
 0x43a   :  { %1262 = vmatprep.subr.mxu0 %v2692_v24  ;;  %1333 = vmatprep.subr.mxu1 %v2698_v25  ;;  %v1683_v24 = vld [vmem:[%s3288_s2 + $0x48] sm:$0xff] }
 0x4d9   :  { %v938_v43 = vpop.f32.mrf.mxu0  ;;  %v1009_v58 = vpop.f32.mrf.mxu1 }
 0x4db   :  { %v940_v53 = vpop.f32.mrf.mxu0  ;;  %v1011_v4 = vpop.f32.mrf.mxu1 }
 0x4dc   :  { %v1018_v54 = vcombine.low %v938_v43, %v940_v53  ;;  %v1019_v55 = vcombine.low %v1009_v58, %v1011_v4  ;;  %v3499_v58 = vld [vmem:[#allocation14_spill] sm:$0xff] }
 0x4de   :  { %v1022_v0 = vadd.f32 %v1682_v52, %v1018_v54  ;;  %v1023_v25 = vadd.f32 %v1683_v24, %v1019_v55 }
 0x4e0   :  { %v1684_v57 = vmul.f32 -1.442695, %v1022_v0  ;;  %v1031_v60 = vrot.slane %v1022_v0, 4  ;;  %v1041_v22 = vrot.slane %v1023_v25, 4 }
 0x4e2   :  { %1771 = vpow2.f32 %v1684_v57  ;;  %v1685_v10 = vmul.f32 -1.442695, %v1031_v60  ;;  %v1686_v50 = vmul.f32 -1.442695, %v1041_v22 }
 0x4e4   :  { %1773 = vpow2.f32 %v1685_v10  ;;  %v1058_v10 = vpop.permute.xlu0 %1057 }
 0x4e5   :  { %1775 = vpow2.f32 %v1686_v50  ;;  %vm1059_vm12 = vcmp.eq.s32.totalorder %v1058_v10, 1  ;;  %v3508_v10 = vld [vmem:[#allocation13_spill] sm:$0xff] }
 0x4ef   :  { %v1772_v48 = vpop.eup %1771 }
 0x4f0   :  { %v1027_v46 = vadd.f32 1.0, %v1772_v48 }
 0x4f1   :  { %v1774_v44 = vpop.eup %1773 }
 0x4f2   :  { %1777 = vrcp.f32 %v1027_v46  ;;  %v1036_v54 = vadd.f32 1.0, %v1774_v44  ;;  %v1776_v0 = vpop.eup %1775 }
 0x4f3   :  { %1779 = vtanh.f32 %v1023_v25  ;;  %v1046_v53 = vadd.f32 1.0, %v1776_v0  ;;  %v3501_v0 = vld [vmem:[#allocation16_spill] sm:$0xff] }
 0x4f4   :  { %1781 = vrcp.f32 %v1036_v54  ;;  %v3500_v54 = vld [vmem:[#allocation8_spill] sm:$0xff] }
 0x4f5   :  { %1783 = vrcp.f32 %v1046_v53  ;;  %v3505_v53 = vld [vmem:[#allocation20_spill] sm:$0xff] }
 0x4ff   :  { %v1778_v4 = vpop.eup %1777 }
 0x500   :  { %v1780_v57 = vpop.eup %1779 }
 0x501   :  { %v1782_v60 = vpop.eup %1781  ;;  %v1050_v52 = vmul.f32 %v1780_v57, %v1778_v4  ;;  %v3502_v4 = vld [vmem:[#allocation9_spill] sm:$0xff]  ;;  %v3503_v57 = vld [vmem:[#allocation18_spill] sm:$0xff] }
 0x502   :  { %v1049_v43 = vmul.f32 %v1782_v60, %v2710_v62  ;;  %v1784_v46 = vpop.eup %1783  ;;  %v3504_v60 = vld [vmem:[#allocation10_spill] sm:$0xff] }
 0x504   :  { %v1051_v24 = vadd.f32 %v1050_v52, %v1049_v43  ;;  %v3506_v43 = vld [vmem:[#allocation11_spill] sm:$0xff]  ;;  %v3507_v52 = vld [vmem:[#allocation21_spill] sm:$0xff] }
 0x506   :  { %1785 = vtanh.f32 %v1051_v24  ;;  %v3105_v22 = vsel %vm1059_vm12, %v1051_v24, %v2710_v62  ;;  %v3496_v62 = vld [vmem:[#allocation26_spill] sm:$0xff] }
 0x507   :  { %v3509_v24 = vld [vmem:[#allocation22_spill] sm:$0xff] }
 0x513   :  { %v1786_v44 = vpop.eup %1785 }
 0x514   :  { %v1053_v25 = vmul.f32 %v1786_v44, %v1784_v46  ;;  %v3510_v46 = vld [vmem:[#allocation15_spill] sm:$0xff] }
 0x515   :  { %v3511_v44 = vld [vmem:[#allocation23_spill] sm:$0xff] }
 0x516   :  { %v3108_v48 = vsel %vm1059_vm12, %v1053_v25, %v2713_v59  ;;  %v1062_v50 = vmax.f32 %v2731_v51, %v1053_v25  ;;  %v3497_v59 = vld [vmem:[#allocation12_spill] sm:$0xff]  ;;  %v3512_v25 = vld [vmem:[#allocation17_spill] sm:$0xff] }
 0x517   :  { %1132 = vmatmul.mubr.f32.vlgmr.msra.gmra.mxu0 %v3108_v48  ;;  %1203 = vmatmul.mubr.f32.vlgmr.msra.gmra.mxu1 %v3108_v48 }
 0x518   :  { %1263 = vmatpush1.msra.mxu0 %v2721_v45  ;;  %1334 = vmatpush1.msra.mxu1 %v2727_v63  ;;  %v3116_v55 = vsel %vm1059_vm12, %v1062_v50, %v2731_v51  ;;  %v3498_v51 = vld [vmem:[#allocation7_spill] sm:$0xff]  ;;  %v3513_v50 = vld [vmem:[#allocation24_spill] sm:$0xff] }
 0x519   :  { %1264 = vmatprep.subr.mxu0 %v2736_v47  ;;  %1335 = vmatprep.subr.mxu1 %v2742_v56 }
 0x51a   :  { %1265 = vmatpush1.msra.mxu0 %v2748_v61  ;;  %1336 = vmatpush1.msra.mxu1 %v2754_v49 }
 0x51b   :  { %1266 = vmatprep.subr.mxu0 %v2760_v7  ;;  %1337 = vmatprep.subr.mxu1 %v2766_v1 }
 0x51c   :  { %1267 = vmatpush1.msra.mxu0 %v2772_v2  ;;  %1338 = vmatpush1.msra.mxu1 %v2778_v3 }
 0x51d   :  { %1268 = vmatprep.subr.mxu0 %v2784_v5  ;;  %1339 = vmatprep.subr.mxu1 %v2790_v6 }
 0x51e   :  { %1269 = vmatpush1.msra.mxu0 %v2796_v8  ;;  %1340 = vmatpush1.msra.mxu1 %v2802_v9 }
 0x51f   :  { %1270 = vmatprep.subr.mxu0 %v2808_v11  ;;  %1341 = vmatprep.subr.mxu1 %v2814_v12 }
 0x520   :  { %1271 = vmatpush1.msra.mxu0 %v2820_v13  ;;  %1342 = vmatpush1.msra.mxu1 %v2826_v14 }
 0x521   :  { %1272 = vmatprep.subr.mxu0 %v2832_v15  ;;  %1343 = vmatprep.subr.mxu1 %v2838_v16 }
 0x522   :  { %1273 = vmatpush1.msra.mxu0 %v2844_v17  ;;  %1344 = vmatpush1.msra.mxu1 %v2850_v18 }
 0x523   :  { %1274 = vmatprep.subr.mxu0 %v2856_v19  ;;  %1345 = vmatprep.subr.mxu1 %v2862_v20 }
 0x524   :  { %1275 = vmatpush1.msra.mxu0 %v2868_v21  ;;  %1346 = vmatpush1.msra.mxu1 %v2874_v23 }
 0x525   :  { %1276 = vmatprep.subr.mxu0 %v2880_v26  ;;  %1347 = vmatprep.subr.mxu1 %v2886_v27 }
 0x526   :  { %1277 = vmatpush1.msra.mxu0 %v2892_v28  ;;  %1348 = vmatpush1.msra.mxu1 %v2898_v29 }
 0x527   :  { %1278 = vmatprep.subr.mxu0 %v2904_v30  ;;  %1349 = vmatprep.subr.mxu1 %v2910_v31 }
 0x528   :  { %1279 = vmatpush1.msra.mxu0 %v2916_v32  ;;  %1350 = vmatpush1.msra.mxu1 %v2922_v33 }
 0x529   :  { %1280 = vmatprep.subr.mxu0 %v2928_v34  ;;  %1351 = vmatprep.subr.mxu1 %v2934_v35 }
 0x52a   :  { %1281 = vmatpush1.msra.mxu0 %v2940_v36  ;;  %1352 = vmatpush1.msra.mxu1 %v2946_v37 }
 0x52b   :  { %1282 = vmatprep.subr.mxu0 %v2952_v38  ;;  %1353 = vmatprep.subr.mxu1 %v2958_v39 }
 0x52c   :  { %1283 = vmatpush1.msra.mxu0 %v2964_v40  ;;  %1354 = vmatpush1.msra.mxu1 %v2970_v41 }
 0x52d   :  { %1284 = vmatprep.subr.mxu0 %v2976_v42  ;;  %1355 = vmatprep.subr.mxu1 %v3496_v62 }
 0x52e   :  { %1285 = vmatpush1.msra.mxu0 %v3497_v59  ;;  %1356 = vmatpush1.msra.mxu1 %v3498_v51 }
 0x52f   :  { %1286 = vmatprep.subr.mxu0 %v3499_v58  ;;  %1357 = vmatprep.subr.mxu1 %v3500_v54 }
 0x530   :  { %1287 = vmatpush1.msra.mxu0 %v3501_v0  ;;  %1358 = vmatpush1.msra.mxu1 %v3502_v4 }
 0x531   :  { %1288 = vmatprep.subr.mxu0 %v3503_v57  ;;  %1359 = vmatprep.subr.mxu1 %v3504_v60  ;;  %v3514_v57 = vmov 0.0   ;;  %v3515_v60 = vld [vmem:[#allocation19_spill] sm:$0xff] }
 0x532   :  { %1289 = vmatpush1.msra.mxu0 %v3505_v53  ;;  %1360 = vmatpush1.msra.mxu1 %v3506_v43  ;;  %v3516_v43 = vld [vmem:[#allocation5_spill] sm:$0xff] }
 0x533   :  { %1290 = vmatprep.subr.mxu0 %v3507_v52  ;;  %1361 = vmatprep.subr.mxu1 %v3508_v10  ;;  %v3517_v52 = vld [vmem:[#allocation6_spill] sm:$0xff] }
 0x534   :  { %1291 = vmatpush1.msra.mxu0 %v3509_v24  ;;  %1362 = vmatpush1.msra.mxu1 %v3510_v46 }
 0x535   :  { %1292 = vmatprep.subr.mxu0 %v3511_v44  ;;  %1363 = vmatprep.subr.mxu1 %v3512_v25  ;;  %v1687_v44 = vld [vmem:[%s3288_s2 + $0x50] sm:$0xff] }
 0x536   :  { %1293 = vmatpush1.msra.mxu0 %v3513_v50  ;;  %1326 = vmatprep.mubr.f32.mxu0 %v3514_v57 }
 0x537   :  { %1364 = vmatpush1.msra.mxu1 %v3515_v60  ;;  %1397 = vmatprep.mubr.f32.mxu1 %v3514_v57 }
 0x538   :  { %1457 = vmatprep.subr.mxu0 %v3516_v43  ;;  %1528 = vmatprep.subr.mxu1 %v3517_v52  ;;  %v1688_v43 = vld [vmem:[%s3288_s2 + $0x58] sm:$0xff] }
 0x5d7   :  { %v1133_v10 = vpop.f32.mrf.mxu0  ;;  %v1204_v24 = vpop.f32.mrf.mxu1 }
 0x5d9   :  { %v1135_v46 = vpop.f32.mrf.mxu0  ;;  %v1206_v50 = vpop.f32.mrf.mxu1 }
 0x5da   :  { %v1213_v25 = vcombine.low %v1133_v10, %v1135_v46  ;;  %v1214_v54 = vcombine.low %v1204_v24, %v1206_v50 }
 0x5dc   :  { %v1217_v53 = vadd.f32 %v1687_v44, %v1213_v25  ;;  %v1218_v52 = vadd.f32 %v1688_v43, %v1214_v54  ;;  %v3518_v54 = vld [vmem:[#allocation28_spill] sm:$0xff] }
 0x5dd   :  { %vm1254_vm13 = vcmp.eq.s32.totalorder %v3518_v54, 1 }
 0x5de   :  { %v1689_v4 = vmul.f32 -1.442695, %v1217_v53  ;;  %v1226_v0 = vrot.slane %v1217_v53, 4  ;;  %v1236_v57 = vrot.slane %v1218_v52, 4 }
 0x5e0   :  { %1787 = vpow2.f32 %v1689_v4  ;;  %v1690_v60 = vmul.f32 -1.442695, %v1226_v0  ;;  %v1691_v58 = vmul.f32 -1.442695, %v1236_v57 }
 0x5e2   :  { %1789 = vpow2.f32 %v1690_v60 }
 0x5e3   :  { %1791 = vpow2.f32 %v1691_v58 }
 0x5ed   :  { %v1788_v51 = vpop.eup %1787 }
 0x5ee   :  { %v1222_v59 = vadd.f32 1.0, %v1788_v51 }
 0x5ef   :  { %v1790_v62 = vpop.eup %1789 }
 0x5f0   :  { %1793 = vrcp.f32 %v1222_v59  ;;  %v1231_v10 = vadd.f32 1.0, %v1790_v62  ;;  %v1792_v53 = vpop.eup %1791 }
 0x5f1   :  { %1795 = vtanh.f32 %v1218_v52  ;;  %v1241_v46 = vadd.f32 1.0, %v1792_v53  ;;  %v1448_v52 = vpop.permute.xlu0 %1447 }
 0x5f2   :  { %1797 = vrcp.f32 %v1231_v10  ;;  %vm1449_vm14 = vcmp.eq.s32.totalorder %v1448_v52, 1 }
 0x5f3   :  { %1799 = vrcp.f32 %v1241_v46 }
 0x5fd   :  { %v1794_v24 = vpop.eup %1793 }
 0x5fe   :  { %v1796_v4 = vpop.eup %1795 }
 0x5ff   :  { %v1798_v0 = vpop.eup %1797  ;;  %v1245_v25 = vmul.f32 %v1796_v4, %v1794_v24 }
 0x600   :  { %v1244_v44 = vmul.f32 %v1798_v0, %v3105_v22  ;;  %v1800_v59 = vpop.eup %1799 }
 0x602   :  { %v1246_v60 = vadd.f32 %v1245_v25, %v1244_v44 }
 0x604   :  { %1801 = vtanh.f32 %v1246_v60  ;;  %v3191_v51 = vsel %vm1254_vm13, %v1246_v60, %v3105_v22 }
 0x611   :  { %v1802_v62 = vpop.eup %1801 }
 0x612   :  { %v1248_v58 = vmul.f32 %v1802_v62, %v1800_v59  ;;  %v1697_v59 = vld [vmem:[%s3288_s2 + $0x70] sm:$0xff] }
 0x614   :  { %v3194_v57 = vsel %vm1254_vm13, %v1248_v58, %v3108_v48  ;;  %v1257_v50 = vmax.f32 %v3116_v55, %v1248_v58 }
 0x615   :  { %1327 = vmatmul.mubr.f32.vlgmr.msra.gmra.mxu0 %v3194_v57  ;;  %1398 = vmatmul.mubr.f32.vlgmr.msra.gmra.mxu1 %v3194_v57 }
 0x616   :  { %1458 = vmatpush1.msra.mxu0 %v2721_v45  ;;  %1529 = vmatpush1.msra.mxu1 %v2727_v63  ;;  %v3202_v43 = vsel %vm1254_vm13, %v1257_v50, %v3116_v55  ;;  %v3519_v45 = vld [vmem:[#allocation26_spill] sm:$0xff]  ;;  %v3520_v63 = vld [vmem:[#allocation12_spill] sm:$0xff] }
 0x617   :  { %1459 = vmatprep.subr.mxu0 %v2736_v47  ;;  %1530 = vmatprep.subr.mxu1 %v2742_v56  ;;  %v3521_v47 = vld [vmem:[#allocation7_spill] sm:$0xff]  ;;  %v3522_v56 = vld [vmem:[#allocation14_spill] sm:$0xff] }
 0x618   :  { %1460 = vmatpush1.msra.mxu0 %v2748_v61  ;;  %1531 = vmatpush1.msra.mxu1 %v2754_v49  ;;  %v3523_v61 = vld [vmem:[#allocation8_spill] sm:$0xff] }
 0x619   :  { %1461 = vmatprep.subr.mxu0 %v2760_v7  ;;  %1532 = vmatprep.subr.mxu1 %v2766_v1  ;;  %v3524_v49 = vld [vmem:[#allocation16_spill] sm:$0xff]  ;;  %v3525_v7 = vld [vmem:[#allocation9_spill] sm:$0xff]  ;;  %v3526_v1 = vld [vmem:[#allocation18_spill] sm:$0xff] }
 0x61a   :  { %1462 = vmatpush1.msra.mxu0 %v2772_v2  ;;  %1533 = vmatpush1.msra.mxu1 %v2778_v3  ;;  %v3527_v2 = vld [vmem:[#allocation10_spill] sm:$0xff]  ;;  %v3528_v3 = vld [vmem:[#allocation20_spill] sm:$0xff] }
 0x61b   :  { %1463 = vmatprep.subr.mxu0 %v2784_v5  ;;  %1534 = vmatprep.subr.mxu1 %v2790_v6  ;;  %v3529_v5 = vld [vmem:[#allocation11_spill] sm:$0xff]  ;;  %v3530_v6 = vld [vmem:[#allocation21_spill] sm:$0xff] }
 0x61c   :  { %1464 = vmatpush1.msra.mxu0 %v2796_v8  ;;  %1535 = vmatpush1.msra.mxu1 %v2802_v9  ;;  %v3531_v8 = vld [vmem:[#allocation13_spill] sm:$0xff]  ;;  %v3532_v9 = vld [vmem:[#allocation22_spill] sm:$0xff] }
 0x61d   :  { %1465 = vmatprep.subr.mxu0 %v2808_v11  ;;  %1536 = vmatprep.subr.mxu1 %v2814_v12  ;;  %v3533_v11 = vld [vmem:[#allocation15_spill] sm:$0xff] }
 0x61e   :  { %1466 = vmatpush1.msra.mxu0 %v2820_v13  ;;  %1537 = vmatpush1.msra.mxu1 %v2826_v14  ;;  %v3534_v12 = vld [vmem:[#allocation23_spill] sm:$0xff]  ;;  %v3535_v13 = vld [vmem:[#allocation17_spill] sm:$0xff]  ;;  %v3536_v14 = vld [vmem:[#allocation24_spill] sm:$0xff] }
 0x61f   :  { %1467 = vmatprep.subr.mxu0 %v2832_v15  ;;  %1538 = vmatprep.subr.mxu1 %v2838_v16  ;;  %v3537_v15 = vmov 0.0   ;;  %v3538_v16 = vld [vmem:[#allocation19_spill] sm:$0xff] }
 0x620   :  { %1468 = vmatpush1.msra.mxu0 %v2844_v17  ;;  %1539 = vmatpush1.msra.mxu1 %v2850_v18 }
 0x621   :  { %1469 = vmatprep.subr.mxu0 %v2856_v19  ;;  %1540 = vmatprep.subr.mxu1 %v2862_v20  ;;  %v1692_v19 = vld [vmem:[%s3288_s2 + $0x60] sm:$0xff] }
 0x622   :  { %1470 = vmatpush1.msra.mxu0 %v2868_v21  ;;  %1541 = vmatpush1.msra.mxu1 %v2874_v23 }
 0x623   :  { %1471 = vmatprep.subr.mxu0 %v2880_v26  ;;  %1542 = vmatprep.subr.mxu1 %v2886_v27 }
 0x624   :  { %1472 = vmatpush1.msra.mxu0 %v2892_v28  ;;  %1543 = vmatpush1.msra.mxu1 %v2898_v29 }
 0x625   :  { %1473 = vmatprep.subr.mxu0 %v2904_v30  ;;  %1544 = vmatprep.subr.mxu1 %v2910_v31  ;;  %v1693_v31 = vld [vmem:[%s3288_s2 + $0x68] sm:$0xff] }
 0x626   :  { %1474 = vmatpush1.msra.mxu0 %v2916_v32  ;;  %1545 = vmatpush1.msra.mxu1 %v2922_v33 }
 0x627   :  { %1475 = vmatprep.subr.mxu0 %v2928_v34  ;;  %1546 = vmatprep.subr.mxu1 %v2934_v35 }
 0x628   :  { %1476 = vmatpush1.msra.mxu0 %v2940_v36  ;;  %1547 = vmatpush1.msra.mxu1 %v2946_v37 }
 0x629   :  { %1477 = vmatprep.subr.mxu0 %v2952_v38  ;;  %1548 = vmatprep.subr.mxu1 %v2958_v39 }
 0x62a   :  { %1478 = vmatpush1.msra.mxu0 %v2964_v40  ;;  %1549 = vmatpush1.msra.mxu1 %v2970_v41 }
 0x62b   :  { %1479 = vmatprep.subr.mxu0 %v2976_v42  ;;  %1550 = vmatprep.subr.mxu1 %v3519_v45 }
 0x62c   :  { %1480 = vmatpush1.msra.mxu0 %v3520_v63  ;;  %1551 = vmatpush1.msra.mxu1 %v3521_v47 }
 0x62d   :  { %1481 = vmatprep.subr.mxu0 %v3522_v56  ;;  %1552 = vmatprep.subr.mxu1 %v3523_v61  ;;  %v1698_v56 = vld [vmem:[%s3288_s2 + $0x78] sm:$0xff]  ;;  %s1923_s2 = smov [#allocation2]  }
 0x62e   :  { %1482 = vmatpush1.msra.mxu0 %v3524_v49  ;;  %1553 = vmatpush1.msra.mxu1 %v3525_v7  ;;  %s1654_s7 = sshll.u32 %s1923_s2, 4  ;;  %s1655_s7 = int_to_ptr.vmem [resolvable:$true] %s1654_s7 }
 0x62f   :  { %1483 = vmatprep.subr.mxu0 %v3526_v1  ;;  %1554 = vmatprep.subr.mxu1 %v3527_v2  ;;  %s1899_s8 = scalar_lea.vmem %s1655_s7, 64  ;;  %p1904_p1 = scmp.lt.s32.totalorder %s1655_s7, %s1655_s7 }
 0x630   :  { %1484 = vmatpush1.msra.mxu0 %v3528_v3  ;;  %1555 = vmatpush1.msra.mxu1 %v3529_v5  ;;  %p1900_p0 = scmp.ne.s32.totalorder %s1655_s7, %s1899_s8  ;;  %p1905_p2 = scmp.lt.s32.totalorder %s1899_s8, %s1899_s8 }
 0x631   :  { %1485 = vmatprep.subr.mxu0 %v3530_v6  ;;  %1556 = vmatprep.subr.mxu1 %v3531_v8 }
 0x632   :  { %1486 = vmatpush1.msra.mxu0 %v3532_v9  ;;  %1557 = vmatpush1.msra.mxu1 %v3533_v11  ;;  %p1906_p3 = por %p1905_p2, %p1904_p1 }
 0x633   :  { %1487 = vmatprep.subr.mxu0 %v3534_v12  ;;  %1558 = vmatprep.subr.mxu1 %v3535_v13 }
 0x634   :  { %1488 = vmatpush1.msra.mxu0 %v3536_v14  ;;  %1521 = vmatprep.mubr.f32.mxu0 %v3537_v15  ;;  %p1907_p4 = pnand %p1906_p3, %p1900_p0 }
 0x635   :  { %1559 = vmatpush1.msra.mxu1 %v3538_v16  ;;  %1592 = vmatprep.mubr.f32.mxu1 %v3537_v15 }
 0x6d5   :  { %v1328_v17 = vpop.f32.mrf.mxu0  ;;  %v1399_v18 = vpop.f32.mrf.mxu1 }
 0x6d7   :  { %v1330_v20 = vpop.f32.mrf.mxu0  ;;  %v1401_v26 = vpop.f32.mrf.mxu1 }
 0x6d8   :  { %v1408_v21 = vcombine.low %v1328_v17, %v1330_v20  ;;  %v1409_v29 = vcombine.low %v1399_v18, %v1401_v26  ;;  %v1644_v17 = vpop.permute.xlu0 %1643 }
 0x6d9   :  { %vm1645_vm15 = vcmp.eq.s32.totalorder %v1644_v17, 1 }
 0x6da   :  { %v1412_v23 = vadd.f32 %v1692_v19, %v1408_v21  ;;  %v1413_v32 = vadd.f32 %v1693_v31, %v1409_v29 }
 0x6dc   :  { %v1694_v27 = vmul.f32 -1.442695, %v1412_v23  ;;  %v1421_v28 = vrot.slane %v1412_v23, 4  ;;  %v1431_v33 = vrot.slane %v1413_v32, 4 }
 0x6de   :  { %1803 = vpow2.f32 %v1694_v27  ;;  %v1695_v30 = vmul.f32 -1.442695, %v1421_v28  ;;  %v1696_v34 = vmul.f32 -1.442695, %v1431_v33 }
 0x6e0   :  { %1805 = vpow2.f32 %v1695_v30 }
 0x6e1   :  { %1807 = vpow2.f32 %v1696_v34 }
 0x6eb   :  { %v1804_v35 = vpop.eup %1803 }
 0x6ec   :  { %v1417_v36 = vadd.f32 1.0, %v1804_v35 }
 0x6ed   :  { %v1806_v37 = vpop.eup %1805 }
 0x6ee   :  { %1809 = vrcp.f32 %v1417_v36  ;;  %v1426_v38 = vadd.f32 1.0, %v1806_v37  ;;  %v1808_v39 = vpop.eup %1807 }
 0x6ef   :  { %1811 = vtanh.f32 %v1413_v32  ;;  %v1436_v22 = vadd.f32 1.0, %v1808_v39 }
 0x6f0   :  { %1813 = vrcp.f32 %v1426_v38 }
 0x6f1   :  { %1815 = vrcp.f32 %v1436_v22 }
 0x6fb   :  { %v1810_v40 = vpop.eup %1809 }
 0x6fc   :  { %v1812_v41 = vpop.eup %1811 }
 0x6fd   :  { %v1814_v42 = vpop.eup %1813  ;;  %v1440_v55 = vmul.f32 %v1812_v41, %v1810_v40 }
 0x6fe   :  { %v1439_v48 = vmul.f32 %v1814_v42, %v3191_v51  ;;  %v1816_v24 = vpop.eup %1815 }
 0x700   :  { %v1441_v10 = vadd.f32 %v1440_v55, %v1439_v48 }
 0x702   :  { %1817 = vtanh.f32 %v1441_v10  ;;  %v1451_v53 = vsel %vm1449_vm14, %v1441_v10, %v3191_v51 }
 0x70f   :  { %v1818_v4 = vpop.eup %1817 }
 0x710   :  { %v1443_v0 = vmul.f32 %v1818_v4, %v1816_v24 }
 0x712   :  { %v1450_v46 = vsel %vm1449_vm14, %v1443_v0, %v3194_v57  ;;  %v1452_v44 = vmax.f32 %v3202_v43, %v1443_v0 }
 0x713   :  { %1522 = vmatmul.mubr.f32.vlgmr.msra.gmra.mxu0 %v1450_v46  ;;  %1593 = vmatmul.mubr.f32.vlgmr.msra.gmra.mxu1 %v1450_v46 }
 0x714   :  { %v1453_v25 = vsel %vm1449_vm14, %v1452_v44, %v3202_v43 }
 0x7d3   :  { %v1523_v60 = vpop.f32.mrf.mxu0  ;;  %v1594_v54 = vpop.f32.mrf.mxu1 }
 0x7d5   :  { %v1525_v62 = vpop.f32.mrf.mxu0  ;;  %v1596_v50 = vpop.f32.mrf.mxu1 }
 0x7d6   :  { %v1603_v58 = vcombine.low %v1523_v60, %v1525_v62  ;;  %v1604_v47 = vcombine.low %v1594_v54, %v1596_v50 }
 0x7d8   :  { %v1607_v51 = vadd.f32 %v1697_v59, %v1603_v58  ;;  %v1608_v43 = vadd.f32 %v1698_v56, %v1604_v47 }
 0x7da   :  { %v1699_v45 = vmul.f32 -1.442695, %v1607_v51  ;;  %v1616_v63 = vrot.slane %v1607_v51, 4  ;;  %v1626_v61 = vrot.slane %v1608_v43, 4 }
 0x7dc   :  { %1819 = vpow2.f32 %v1699_v45  ;;  %v1700_v57 = vmul.f32 -1.442695, %v1616_v63  ;;  %v1701_v49 = vmul.f32 -1.442695, %v1626_v61 }
 0x7de   :  { %1821 = vpow2.f32 %v1700_v57 }
 0x7df   :  { %1823 = vpow2.f32 %v1701_v49 }
 0x7e9   :  { %v1820_v7 = vpop.eup %1819 }
 0x7ea   :  { %v1612_v1 = vadd.f32 1.0, %v1820_v7 }
 0x7eb   :  { %v1822_v2 = vpop.eup %1821 }
 0x7ec   :  { %1825 = vrcp.f32 %v1612_v1  ;;  %v1621_v3 = vadd.f32 1.0, %v1822_v2  ;;  %v1824_v5 = vpop.eup %1823 }
 0x7ed   :  { %1827 = vtanh.f32 %v1608_v43  ;;  %v1631_v11 = vadd.f32 1.0, %v1824_v5 }
 0x7ee   :  { %1829 = vrcp.f32 %v1621_v3 }
 0x7ef   :  { %1831 = vrcp.f32 %v1631_v11 }
 0x7f9   :  { %v1826_v6 = vpop.eup %1825 }
 0x7fa   :  { %v1828_v8 = vpop.eup %1827 }
 0x7fb   :  { %v1830_v9 = vpop.eup %1829  ;;  %v1635_v13 = vmul.f32 %v1828_v8, %v1826_v6 }
 0x7fc   :  { %v1634_v12 = vmul.f32 %v1830_v9, %v1451_v53  ;;  %v1832_v15 = vpop.eup %1831 }
 0x7fe   :  { %v1636_v14 = vadd.f32 %v1635_v13, %v1634_v12 }
 0x800   :  { %1833 = vtanh.f32 %v1636_v14 }
 0x80d   :  { %v1834_v16 = vpop.eup %1833 }
 0x80e   :  { %v1638_v18 = vmul.f32 %v1834_v16, %v1832_v15 }
 0x810   :  { %v1640_v19 = vmax.f32 %v1453_v25, %v1638_v18 }
 0x812   :  { %v1646_v20 = vsel %vm1645_vm15, %v1640_v19, %v1453_v25 }
 0x813   :  { %1647 = vst [vmem:[#allocation2] sm:$0xf] %v1646_v20 }
 0x814   :  { %1910 = shalt.err (!%p1907_p4)
}
 0x815   :  { %1657 = dma.vmem_to_hbm [thread:$0]  %s1655_s7, 64, %s3290_s4, [#allocation3]  }
 0x816   :  { %1919 = dma.done.wait [#allocation3], 64  }
 0x817   :  { %1920 = vsyncadd [#allocation3], 4294967232 }
 0x818   :  { %1661 = vsyncpa [#allocation3], 1 }

</bundles_post_ra>
